<compile_context>
chip_gen: v7x
topology: tpu7x:2x2x1
jax: 0.10.0
libtpu: 0.0.40
codegen_flags: <defaults>
</compile_context>

<pallas_src>
import math
from functools import partial

import jax
import jax.numpy as jnp
from jax import lax
from jax.experimental import pallas as pl
from jax.experimental.pallas import tpu as pltpu

BATCH = 2
SEQ = 16
SEQ_TILE = 8          # grid = (BATCH, SEQ // SEQ_TILE) = (2, 2): 4 parallel steps
HIDDEN = 32
NUM_HEADS = 4
MLP_RATIO = 4.0
MLP_HIDDEN = int(HIDDEN * MLP_RATIO)
EPS = 1e-6


# ---------------------------------------------------------------------------
# shared math helpers (used by both the kernel and the pure-JAX reference)
# ---------------------------------------------------------------------------
def _layernorm(z):
    mu = jnp.mean(z, axis=-1, keepdims=True)
    zc = z - mu
    var = jnp.mean(zc * zc, axis=-1, keepdims=True)
    return zc * lax.rsqrt(var + EPS)          # rsqrt -> EUP slot (free vs. VPU divide)


def _gelu_tanh(z):
    k = math.sqrt(2.0 / math.pi)
    return 0.5 * z * (1.0 + jnp.tanh(k * (z + 0.044715 * z * z * z)))


# ---------------------------------------------------------------------------
# Pallas kernel: one (batch row, query tile) per grid step
# ---------------------------------------------------------------------------
def dit_block_kernel(x_ref, mods_ref, wq_ref, wk_ref, wv_ref,
                     bq_ref, bk_ref, bv_ref, proj_w_ref, proj_b_ref,
                     w1_ref, b1_ref, w2_ref, b2_ref, out_ref,
                     *, num_heads, seq_tile, matmul_dtype):
    d = x_ref.shape[-1]
    hd = d // num_heads
    tq = seq_tile
    cast = lambda a: a.astype(matmul_dtype)   # matmul operands only; math stays f32

    row0 = pl.multiple_of(pl.program_id(1) * tq, tq)

    x_all = x_ref[...]                        # (N, D)  keys/values source
    x_t = x_ref[pl.ds(row0, tq), :]           # (TQ, D) this step's query rows

    shift_msa = mods_ref[0]                   # each (1, D), f32
    scale_msa = mods_ref[1]
    gate_msa = mods_ref[2]
    shift_mlp = mods_ref[3]
    scale_mlp = mods_ref[4]
    gate_mlp = mods_ref[5]

    # ---- attention branch ---------------------------------------------------
    xm_all = _layernorm(x_all) * (1.0 + scale_msa) + shift_msa
    xm_t = _layernorm(x_t) * (1.0 + scale_msa) + shift_msa
    xm_all_c = cast(xm_all)
    xm_t_c = cast(xm_t)

    scale = 1.0 / math.sqrt(hd)

    def head_body(h, acc):
        # Per-head weights live on a leading axis -> no lane/sublane slicing.
        q_h = jnp.dot(xm_t_c, wq_ref[h], preferred_element_type=jnp.float32) + bq_ref[h]
        k_h = jnp.dot(xm_all_c, wk_ref[h], preferred_element_type=jnp.float32) + bk_ref[h]
        v_h = jnp.dot(xm_all_c, wv_ref[h], preferred_element_type=jnp.float32) + bv_ref[h]
        # q_h @ k_h^T via contraction on the head dim (no explicit transpose).
        logits = lax.dot_general(cast(q_h), cast(k_h), (((1,), (1,)), ((), ())),
                                 preferred_element_type=jnp.float32) * scale
        logits = logits - jnp.max(logits, axis=-1, keepdims=True)
        p = jnp.exp(logits)
        p = p * pl.reciprocal(jnp.sum(p, axis=-1, keepdims=True), approx=False)
        o_h = jnp.dot(cast(p), cast(v_h), preferred_element_type=jnp.float32)
        # Fold the head output straight into the output projection: no concat.
        return acc + jnp.dot(cast(o_h), proj_w_ref[h],
                             preferred_element_type=jnp.float32)

    attn = lax.fori_loop(0, num_heads, head_body,
                         jnp.zeros((tq, d), jnp.float32), unroll=True)
    attn = attn + proj_b_ref[...]

    x_t = x_t + gate_msa * attn

    # ---- MLP branch ---------------------------------------------------------
    xm2 = _layernorm(x_t) * (1.0 + scale_mlp) + shift_mlp
    h1 = jnp.dot(cast(xm2), w1_ref[...], preferred_element_type=jnp.float32) + b1_ref[...]
    h1 = _gelu_tanh(h1)
    h2 = jnp.dot(cast(h1), w2_ref[...], preferred_element_type=jnp.float32) + b2_ref[...]

    out_ref[...] = (x_t + gate_mlp * h2).astype(out_ref.dtype)


# ---------------------------------------------------------------------------
# wrapper
# ---------------------------------------------------------------------------
def dit_block(x, c, params, num_heads=NUM_HEADS, seq_tile=None,
              matmul_dtype=jnp.float32):
    """x: (B, N, D) f32, c: (B, D) f32 -> (B, N, D) f32."""
    B, N, D = x.shape
    M = params["mlp_w1"].shape[-1]
    H = num_heads
    hd = D // H
    if seq_tile is None:
        seq_tile = N
    assert N % seq_tile == 0 and (seq_tile == N or seq_tile % 8 == 0)
    T = N // seq_tile

    x = x.astype(jnp.float32)
    c = c.astype(jnp.float32)

    # adaLN-Zero modulation hoisted out of the kernel (M=1 GEMV; MXU can't fill
    # it and its 6*D^2 weight would dominate resident VMEM).
    mods = jax.nn.silu(c) @ params["ada_w"] + params["ada_b"]      # (B, 6D)
    mods = mods.reshape(B, 6, 1, D).astype(jnp.float32)            # (B, 6, 1, D)

    # Pre-split attention weights per head on a leading axis (no lane slicing
    # inside the kernel).  Weight matrices take matmul_dtype (bf16 on v6e/v7x);
    # biases stay f32 (added post-matmul on the VPU).
    wd = matmul_dtype
    qkv_w = params["qkv_w"].reshape(D, 3, H, hd).transpose(1, 2, 0, 3)  # (3,H,D,hd)
    wq = qkv_w[0].astype(wd)
    wk = qkv_w[1].astype(wd)
    wv = qkv_w[2].astype(wd)
    qkv_b = params["qkv_b"].reshape(3, H, 1, hd).astype(jnp.float32)
    bq, bk, bv = qkv_b[0], qkv_b[1], qkv_b[2]
    proj_w = params["proj_w"].reshape(H, hd, D).astype(wd)              # (H,hd,D)
    proj_b = params["proj_b"].reshape(1, D).astype(jnp.float32)
    w1 = params["mlp_w1"].astype(wd)
    b1 = params["mlp_b1"].reshape(1, M).astype(jnp.float32)
    w2 = params["mlp_w2"].astype(wd)
    b2 = params["mlp_b2"].reshape(1, D).astype(jnp.float32)

    args = (x, mods, wq, wk, wv, bq, bk, bv, proj_w, proj_b, w1, b1, w2, b2)

    def resident(shape):
        # Constant index_map -> DMA'd once; Buffered(1) -> single-buffered in VMEM.
        nd = len(shape)
        if nd == 2:
            imap = lambda b, t: (0, 0)
        elif nd == 3:
            imap = lambda b, t: (0, 0, 0)
        else:
            imap = lambda b, t: (0, 0, 0, 0)
        return pl.BlockSpec(shape, imap, pipeline_mode=pl.Buffered(1))

    in_specs = [
        pl.BlockSpec((pl.Squeezed(), N, D), lambda b, t: (b, 0, 0)),        # x (full seq)
        pl.BlockSpec((pl.Squeezed(), 6, 1, D), lambda b, t: (b, 0, 0, 0)),  # modulation
        resident((H, D, hd)), resident((H, D, hd)), resident((H, D, hd)),   # wq, wk, wv
        resident((H, 1, hd)), resident((H, 1, hd)), resident((H, 1, hd)),   # bq, bk, bv
        resident((H, hd, D)), resident((1, D)),                             # proj
        resident((D, M)), resident((1, M)),                                 # mlp fc1
        resident((M, D)), resident((1, D)),                                 # mlp fc2
    ]
    out_specs = pl.BlockSpec((pl.Squeezed(), seq_tile, D), lambda b, t: (b, t, 0))

    # Advisory cost estimate so XLA schedules this custom call sensibly.
    step_flops = (2 * seq_tile * D * D        # q projections (all heads)
                  + 4 * N * D * D             # k and v projections
                  + 4 * seq_tile * N * D      # q k^T and attn @ v
                  + 2 * seq_tile * D * D      # output projection
                  + 4 * seq_tile * D * M)     # two MLP matmuls
    flops = B * T * step_flops
    transcendentals = B * T * (H * seq_tile * N + seq_tile * M + 4 * seq_tile)
    bytes_accessed = int(sum(a.size * a.dtype.itemsize for a in args)
                         + B * N * D * 4)

    return pl.pallas_call(
        partial(dit_block_kernel, num_heads=num_heads, seq_tile=seq_tile,
                matmul_dtype=matmul_dtype),
        out_shape=jax.ShapeDtypeStruct((B, N, D), jnp.float32),
        grid=(B, T),
        in_specs=in_specs,
        out_specs=out_specs,
        compiler_params=pltpu.CompilerParams(
            dimension_semantics=("parallel", "parallel"),
            vmem_limit_bytes=48 * 1024 * 1024),   # > 16/32 MiB defaults, < v7x 64 MiB cap
        cost_estimate=pl.CostEstimate(flops=int(flops),
                                      transcendentals=int(transcendentals),
                                      bytes_accessed=bytes_accessed),
    )(*args)


# ---------------------------------------------------------------------------
# parameters (deterministic; (in, out) layout matching the nn.Module)
# ---------------------------------------------------------------------------
def init_params(key, hidden=HIDDEN, mlp_hidden=MLP_HIDDEN):
    ks = jax.random.split(key, 10)
    f = lambda k, shape: jax.random.normal(k, shape, jnp.float32) * 0.02
    return dict(
        ada_w=f(ks[0], (hidden, 6 * hidden)), ada_b=f(ks[1], (6 * hidden,)),
        qkv_w=f(ks[2], (hidden, 3 * hidden)), qkv_b=f(ks[3], (3 * hidden,)),
        proj_w=f(ks[4], (hidden, hidden)),    proj_b=f(ks[5], (hidden,)),
        mlp_w1=f(ks[6], (hidden, mlp_hidden)), mlp_b1=f(ks[7], (mlp_hidden,)),
        mlp_w2=f(ks[8], (mlp_hidden, hidden)), mlp_b2=f(ks[9], (hidden,)),
    )


# ---------------------------------------------------------------------------
# pure-JAX reference mirroring the PyTorch module
# ---------------------------------------------------------------------------
def reference_forward(x, c, params, num_heads=NUM_HEADS):
    B, N, D = x.shape
    hd = D // num_heads

    mod = (c * jax.nn.sigmoid(c)) @ params["ada_w"] + params["ada_b"]   # (B, 6D)
    shift_msa, scale_msa, gate_msa, shift_mlp, scale_mlp, gate_mlp = \
        jnp.split(mod, 6, axis=1)

    def modulate(z, shift, scale):
        return z * (1.0 + scale[:, None, :]) + shift[:, None, :]

    # attention (timm layout: qkv reshape -> (B, N, 3, H, hd))
    h = modulate(_layernorm(x), shift_msa, scale_msa)
    qkv = (h @ params["qkv_w"] + params["qkv_b"]).reshape(B, N, 3, num_heads, hd)
    q = qkv[:, :, 0].transpose(0, 2, 1, 3)
    k = qkv[:, :, 1].transpose(0, 2, 1, 3)
    v = qkv[:, :, 2].transpose(0, 2, 1, 3)
    attn = jnp.einsum("bhqd,bhkd->bhqk", q, k) * (hd ** -0.5)
    attn = jax.nn.softmax(attn, axis=-1)
    o = jnp.einsum("bhqk,bhkd->bhqd", attn, v)
    o = o.transpose(0, 2, 1, 3).reshape(B, N, D)
    o = o @ params["proj_w"] + params["proj_b"]
    x = x + gate_msa[:, None, :] * o

    # mlp
    h2 = modulate(_layernorm(x), shift_mlp, scale_mlp)
    m = _gelu_tanh(h2 @ params["mlp_w1"] + params["mlp_b1"])
    m = m @ params["mlp_w2"] + params["mlp_b2"]
    return x + gate_mlp[:, None, :] * m


if __name__ == "__main__":
    key = jax.random.PRNGKey(0)
    kx, kc, kp = jax.random.split(key, 3)

    x = jax.random.normal(kx, (BATCH, SEQ, HIDDEN), jnp.float32)
    c = jax.random.normal(kc, (BATCH, HIDDEN), jnp.float32)
    params = init_params(kp)

    ref = reference_forward(x, c, params, num_heads=NUM_HEADS)

    # f32 matmul path (strict correctness at toy scale)
    out = dit_block(x, c, params, num_heads=NUM_HEADS, seq_tile=SEQ_TILE,
                    matmul_dtype=jnp.float32)
    out = jax.block_until_ready(out)
    assert out.shape == (BATCH, SEQ, HIDDEN), out.shape
    max_err = float(jnp.max(jnp.abs(out - ref)))
    assert max_err < 1e-4, max_err

    # bf16 matmul path (what you would run on v6e/v7x); elementwise stays f32.
    out_bf16 = dit_block(x, c, params, num_heads=NUM_HEADS, seq_tile=SEQ_TILE,
                         matmul_dtype=jnp.bfloat16)
    out_bf16 = jax.block_until_ready(out_bf16)
    max_err_bf16 = float(jnp.max(jnp.abs(out_bf16 - ref)))
    assert max_err_bf16 < 2e-2, max_err_bf16

    print("KERNEL_OK")
</pallas_src>

<mosaic_0001>
module attributes {stable_mosaic.version = 11 : i64} {
  func.func @dit_block_kernel(%arg0: i32, %arg1: i32, %arg2: memref<1x16x32xf32, #tpu.memory_space<vmem>>, %arg3: memref<1x6x1x32xf32, #tpu.memory_space<vmem>>, %arg4: memref<4x32x8xf32, #tpu.memory_space<vmem>>, %arg5: memref<4x32x8xf32, #tpu.memory_space<vmem>>, %arg6: memref<4x32x8xf32, #tpu.memory_space<vmem>>, %arg7: memref<4x1x8xf32, #tpu.memory_space<vmem>>, %arg8: memref<4x1x8xf32, #tpu.memory_space<vmem>>, %arg9: memref<4x1x8xf32, #tpu.memory_space<vmem>>, %arg10: memref<4x8x32xf32, #tpu.memory_space<vmem>>, %arg11: memref<1x32xf32, #tpu.memory_space<vmem>>, %arg12: memref<32x128xf32, #tpu.memory_space<vmem>>, %arg13: memref<1x128xf32, #tpu.memory_space<vmem>>, %arg14: memref<128x32xf32, #tpu.memory_space<vmem>>, %arg15: memref<1x32xf32, #tpu.memory_space<vmem>>, %arg16: memref<1x8x32xf32, #tpu.memory_space<vmem>>) attributes {dimension_semantics = [#tpu.dimension_semantics<parallel>, #tpu.dimension_semantics<parallel>], iteration_bounds = array<i64: 2, 2>, scalar_prefetch = 0 : i64, scratch_operands = 0 : i64, tpu.core_type = #tpu.core_type<tc>, window_params = [{transform_indices = @transform_0, window_bounds = array<i64: 1, 16, 32>}, {transform_indices = @transform_1, window_bounds = array<i64: 1, 6, 1, 32>}, {pipeline_mode = #tpu.pipeline_mode<synchronous>, transform_indices = @transform_2, window_bounds = array<i64: 4, 32, 8>}, {pipeline_mode = #tpu.pipeline_mode<synchronous>, transform_indices = @transform_3, window_bounds = array<i64: 4, 32, 8>}, {pipeline_mode = #tpu.pipeline_mode<synchronous>, transform_indices = @transform_4, window_bounds = array<i64: 4, 32, 8>}, {pipeline_mode = #tpu.pipeline_mode<synchronous>, transform_indices = @transform_5, window_bounds = array<i64: 4, 1, 8>}, {pipeline_mode = #tpu.pipeline_mode<synchronous>, transform_indices = @transform_6, window_bounds = array<i64: 4, 1, 8>}, {pipeline_mode = #tpu.pipeline_mode<synchronous>, transform_indices = @transform_7, window_bounds = array<i64: 4, 1, 8>}, {pipeline_mode = #tpu.pipeline_mode<synchronous>, transform_indices = @transform_8, window_bounds = array<i64: 4, 8, 32>}, {pipeline_mode = #tpu.pipeline_mode<synchronous>, transform_indices = @transform_9, window_bounds = array<i64: 1, 32>}, {pipeline_mode = #tpu.pipeline_mode<synchronous>, transform_indices = @transform_10, window_bounds = array<i64: 32, 128>}, {pipeline_mode = #tpu.pipeline_mode<synchronous>, transform_indices = @transform_11, window_bounds = array<i64: 1, 128>}, {pipeline_mode = #tpu.pipeline_mode<synchronous>, transform_indices = @transform_12, window_bounds = array<i64: 128, 32>}, {pipeline_mode = #tpu.pipeline_mode<synchronous>, transform_indices = @transform_13, window_bounds = array<i64: 1, 32>}, {transform_indices = @transform_14, window_bounds = array<i64: 1, 8, 32>}]} {
    %c8_i32 = arith.constant 8 : i32
    %0 = arith.muli %arg1, %c8_i32 : i32
    %1 = tpu.assume_multiple %0, 8 : i32
    %c0 = arith.constant 0 : index
    %c0_0 = arith.constant 0 : index
    %c0_1 = arith.constant 0 : index
    %2 = vector.load %arg2[%c0, %c0_0, %c0_1] : memref<1x16x32xf32, #tpu.memory_space<vmem>>, vector<1x16x32xf32>
    %3 = vector.shape_cast %2 : vector<1x16x32xf32> to vector<16x32xf32>
    %c0_2 = arith.constant 0 : index
    %4 = arith.index_cast %1 : i32 to index
    %c0_3 = arith.constant 0 : index
    %5 = vector.load %arg2[%c0_2, %4, %c0_3] : memref<1x16x32xf32, #tpu.memory_space<vmem>>, vector<1x8x32xf32>
    %6 = vector.shape_cast %5 : vector<1x8x32xf32> to vector<8x32xf32>
    %c0_4 = arith.constant 0 : index
    %c0_5 = arith.constant 0 : index
    %c0_6 = arith.constant 0 : index
    %c0_7 = arith.constant 0 : index
    %7 = vector.load %arg3[%c0_4, %c0_5, %c0_6, %c0_7] : memref<1x6x1x32xf32, #tpu.memory_space<vmem>>, vector<1x1x1x32xf32>
    %8 = vector.shape_cast %7 : vector<1x1x1x32xf32> to vector<1x32xf32>
    %c0_8 = arith.constant 0 : index
    %c1 = arith.constant 1 : index
    %c0_9 = arith.constant 0 : index
    %c0_10 = arith.constant 0 : index
    %9 = vector.load %arg3[%c0_8, %c1, %c0_9, %c0_10] : memref<1x6x1x32xf32, #tpu.memory_space<vmem>>, vector<1x1x1x32xf32>
    %10 = vector.shape_cast %9 : vector<1x1x1x32xf32> to vector<1x32xf32>
    %c0_11 = arith.constant 0 : index
    %c2 = arith.constant 2 : index
    %c0_12 = arith.constant 0 : index
    %c0_13 = arith.constant 0 : index
    %11 = vector.load %arg3[%c0_11, %c2, %c0_12, %c0_13] : memref<1x6x1x32xf32, #tpu.memory_space<vmem>>, vector<1x1x1x32xf32>
    %12 = vector.shape_cast %11 : vector<1x1x1x32xf32> to vector<1x32xf32>
    %c0_14 = arith.constant 0 : index
    %c3 = arith.constant 3 : index
    %c0_15 = arith.constant 0 : index
    %c0_16 = arith.constant 0 : index
    %13 = vector.load %arg3[%c0_14, %c3, %c0_15, %c0_16] : memref<1x6x1x32xf32, #tpu.memory_space<vmem>>, vector<1x1x1x32xf32>
    %14 = vector.shape_cast %13 : vector<1x1x1x32xf32> to vector<1x32xf32>
    %c0_17 = arith.constant 0 : index
    %c4 = arith.constant 4 : index
    %c0_18 = arith.constant 0 : index
    %c0_19 = arith.constant 0 : index
    %15 = vector.load %arg3[%c0_17, %c4, %c0_18, %c0_19] : memref<1x6x1x32xf32, #tpu.memory_space<vmem>>, vector<1x1x1x32xf32>
    %16 = vector.shape_cast %15 : vector<1x1x1x32xf32> to vector<1x32xf32>
    %c0_20 = arith.constant 0 : index
    %c5 = arith.constant 5 : index
    %c0_21 = arith.constant 0 : index
    %c0_22 = arith.constant 0 : index
    %17 = vector.load %arg3[%c0_20, %c5, %c0_21, %c0_22] : memref<1x6x1x32xf32, #tpu.memory_space<vmem>>, vector<1x1x1x32xf32>
    %18 = vector.shape_cast %17 : vector<1x1x1x32xf32> to vector<1x32xf32>
    %cst = arith.constant dense<0.000000e+00> : vector<16xf32>
    %19 = vector.multi_reduction <add>, %3, %cst [1] : vector<16x32xf32> to vector<16xf32>
    %20 = vector.shape_cast %19 : vector<16xf32> to vector<16x1xf32>
    %cst_23 = arith.constant 3.200000e+01 : f32
    %21 = vector.broadcast %cst_23 : f32 to vector<16x1xf32>
    %22 = arith.divf %20, %21 : vector<16x1xf32>
    %23 = vector.broadcast %22 : vector<16x1xf32> to vector<16x32xf32>
    %24 = arith.subf %3, %23 : vector<16x32xf32>
    %25 = arith.mulf %24, %24 : vector<16x32xf32>
    %cst_24 = arith.constant dense<0.000000e+00> : vector<16xf32>
    %26 = vector.multi_reduction <add>, %25, %cst_24 [1] : vector<16x32xf32> to vector<16xf32>
    %27 = vector.shape_cast %26 : vector<16xf32> to vector<16x1xf32>
    %cst_25 = arith.constant 3.200000e+01 : f32
    %28 = vector.broadcast %cst_25 : f32 to vector<16x1xf32>
    %29 = arith.divf %27, %28 : vector<16x1xf32>
    %cst_26 = arith.constant 9.99999997E-7 : f32
    %30 = vector.broadcast %cst_26 : f32 to vector<16x1xf32>
    %31 = arith.addf %29, %30 : vector<16x1xf32>
    %32 = math.rsqrt %31 : vector<16x1xf32>
    %33 = vector.broadcast %32 : vector<16x1xf32> to vector<16x32xf32>
    %34 = arith.mulf %24, %33 : vector<16x32xf32>
    %cst_27 = arith.constant 1.000000e+00 : f32
    %35 = vector.broadcast %cst_27 : f32 to vector<1x32xf32>
    %36 = arith.addf %35, %10 : vector<1x32xf32>
    %37 = vector.broadcast %36 : vector<1x32xf32> to vector<16x32xf32>
    %38 = arith.mulf %34, %37 : vector<16x32xf32>
    %39 = vector.broadcast %8 : vector<1x32xf32> to vector<16x32xf32>
    %40 = arith.addf %38, %39 : vector<16x32xf32>
    %cst_28 = arith.constant dense<0.000000e+00> : vector<8xf32>
    %41 = vector.multi_reduction <add>, %6, %cst_28 [1] : vector<8x32xf32> to vector<8xf32>
    %42 = vector.shape_cast %41 : vector<8xf32> to vector<8x1xf32>
    %cst_29 = arith.constant 3.200000e+01 : f32
    %43 = vector.broadcast %cst_29 : f32 to vector<8x1xf32>
    %44 = arith.divf %42, %43 : vector<8x1xf32>
    %45 = vector.broadcast %44 : vector<8x1xf32> to vector<8x32xf32>
    %46 = arith.subf %6, %45 : vector<8x32xf32>
    %47 = arith.mulf %46, %46 : vector<8x32xf32>
    %cst_30 = arith.constant dense<0.000000e+00> : vector<8xf32>
    %48 = vector.multi_reduction <add>, %47, %cst_30 [1] : vector<8x32xf32> to vector<8xf32>
    %49 = vector.shape_cast %48 : vector<8xf32> to vector<8x1xf32>
    %cst_31 = arith.constant 3.200000e+01 : f32
    %50 = vector.broadcast %cst_31 : f32 to vector<8x1xf32>
    %51 = arith.divf %49, %50 : vector<8x1xf32>
    %cst_32 = arith.constant 9.99999997E-7 : f32
    %52 = vector.broadcast %cst_32 : f32 to vector<8x1xf32>
    %53 = arith.addf %51, %52 : vector<8x1xf32>
    %54 = math.rsqrt %53 : vector<8x1xf32>
    %55 = vector.broadcast %54 : vector<8x1xf32> to vector<8x32xf32>
    %56 = arith.mulf %46, %55 : vector<8x32xf32>
    %cst_33 = arith.constant 1.000000e+00 : f32
    %57 = vector.broadcast %cst_33 : f32 to vector<1x32xf32>
    %58 = arith.addf %57, %10 : vector<1x32xf32>
    %59 = vector.broadcast %58 : vector<1x32xf32> to vector<8x32xf32>
    %60 = arith.mulf %56, %59 : vector<8x32xf32>
    %61 = vector.broadcast %8 : vector<1x32xf32> to vector<8x32xf32>
    %62 = arith.addf %60, %61 : vector<8x32xf32>
    %cst_34 = arith.constant 0.000000e+00 : f32
    %63 = vector.broadcast %cst_34 : f32 to vector<8x32xf32>
    %c0_i32 = arith.constant 0 : i32
    %64 = arith.index_cast %c0_i32 : i32 to index
    %c0_35 = arith.constant 0 : index
    %c0_36 = arith.constant 0 : index
    %65 = vector.load %arg4[%64, %c0_35, %c0_36] : memref<4x32x8xf32, #tpu.memory_space<vmem>>, vector<1x32x8xf32>
    %66 = vector.shape_cast %65 : vector<1x32x8xf32> to vector<32x8xf32>
    %cst_37 = arith.constant dense<0.000000e+00> : vector<8x8xf32>
    %67 = tpu.matmul %62, %66, %cst_37 {dimension_numbers = #tpu.dot_dimension_numbers<[1], [0], [0], [1], [0, 0, 1, 1], [], []>} : vector<8x32xf32>, vector<32x8xf32>, vector<8x8xf32> -> vector<8x8xf32>
    %68 = arith.index_cast %c0_i32 : i32 to index
    %c0_38 = arith.constant 0 : index
    %c0_39 = arith.constant 0 : index
    %69 = vector.load %arg7[%68, %c0_38, %c0_39] : memref<4x1x8xf32, #tpu.memory_space<vmem>>, vector<1x1x8xf32>
    %70 = vector.shape_cast %69 : vector<1x1x8xf32> to vector<1x8xf32>
    %71 = vector.broadcast %70 : vector<1x8xf32> to vector<8x8xf32>
    %72 = arith.addf %67, %71 : vector<8x8xf32>
    %73 = arith.index_cast %c0_i32 : i32 to index
    %c0_40 = arith.constant 0 : index
    %c0_41 = arith.constant 0 : index
    %74 = vector.load %arg5[%73, %c0_40, %c0_41] : memref<4x32x8xf32, #tpu.memory_space<vmem>>, vector<1x32x8xf32>
    %75 = vector.shape_cast %74 : vector<1x32x8xf32> to vector<32x8xf32>
    %cst_42 = arith.constant dense<0.000000e+00> : vector<16x8xf32>
    %76 = tpu.matmul %40, %75, %cst_42 {dimension_numbers = #tpu.dot_dimension_numbers<[1], [0], [0], [1], [0, 0, 1, 1], [], []>} : vector<16x32xf32>, vector<32x8xf32>, vector<16x8xf32> -> vector<16x8xf32>
    %77 = arith.index_cast %c0_i32 : i32 to index
    %c0_43 = arith.constant 0 : index
    %c0_44 = arith.constant 0 : index
    %78 = vector.load %arg8[%77, %c0_43, %c0_44] : memref<4x1x8xf32, #tpu.memory_space<vmem>>, vector<1x1x8xf32>
    %79 = vector.shape_cast %78 : vector<1x1x8xf32> to vector<1x8xf32>
    %80 = vector.broadcast %79 : vector<1x8xf32> to vector<16x8xf32>
    %81 = arith.addf %76, %80 : vector<16x8xf32>
    %82 = arith.index_cast %c0_i32 : i32 to index
    %c0_45 = arith.constant 0 : index
    %c0_46 = arith.constant 0 : index
    %83 = vector.load %arg6[%82, %c0_45, %c0_46] : memref<4x32x8xf32, #tpu.memory_space<vmem>>, vector<1x32x8xf32>
    %84 = vector.shape_cast %83 : vector<1x32x8xf32> to vector<32x8xf32>
    %cst_47 = arith.constant dense<0.000000e+00> : vector<16x8xf32>
    %85 = tpu.matmul %40, %84, %cst_47 {dimension_numbers = #tpu.dot_dimension_numbers<[1], [0], [0], [1], [0, 0, 1, 1], [], []>} : vector<16x32xf32>, vector<32x8xf32>, vector<16x8xf32> -> vector<16x8xf32>
    %86 = arith.index_cast %c0_i32 : i32 to index
    %c0_48 = arith.constant 0 : index
    %c0_49 = arith.constant 0 : index
    %87 = vector.load %arg9[%86, %c0_48, %c0_49] : memref<4x1x8xf32, #tpu.memory_space<vmem>>, vector<1x1x8xf32>
    %88 = vector.shape_cast %87 : vector<1x1x8xf32> to vector<1x8xf32>
    %89 = vector.broadcast %88 : vector<1x8xf32> to vector<16x8xf32>
    %90 = arith.addf %85, %89 : vector<16x8xf32>
    %cst_50 = arith.constant dense<0.000000e+00> : vector<8x16xf32>
    %91 = tpu.matmul %72, %81, %cst_50 {dimension_numbers = #tpu.dot_dimension_numbers<[1], [1], [0], [0], [0, 0, 1, 0], [], []>} : vector<8x8xf32>, vector<16x8xf32>, vector<8x16xf32> -> vector<8x16xf32>
    %cst_51 = arith.constant 0.353553385 : f32
    %92 = vector.broadcast %cst_51 : f32 to vector<8x16xf32>
    %93 = arith.mulf %91, %92 : vector<8x16xf32>
    %cst_52 = arith.constant dense<0xFF800000> : vector<8xf32>
    %94 = vector.multi_reduction <maximumf>, %93, %cst_52 [1] : vector<8x16xf32> to vector<8xf32>
    %95 = vector.shape_cast %94 : vector<8xf32> to vector<8x1xf32>
    %96 = vector.broadcast %95 : vector<8x1xf32> to vector<8x16xf32>
    %97 = arith.subf %93, %96 : vector<8x16xf32>
    %98 = math.exp %97 : vector<8x16xf32>
    %cst_53 = arith.constant dense<0.000000e+00> : vector<8xf32>
    %99 = vector.multi_reduction <add>, %98, %cst_53 [1] : vector<8x16xf32> to vector<8xf32>
    %100 = vector.shape_cast %99 : vector<8xf32> to vector<8x1xf32>
    %101 = tpu.reciprocal %100 : vector<8x1xf32> -> vector<8x1xf32>
    %102 = vector.broadcast %101 : vector<8x1xf32> to vector<8x16xf32>
    %103 = arith.mulf %98, %102 : vector<8x16xf32>
    %cst_54 = arith.constant dense<0.000000e+00> : vector<8x8xf32>
    %104 = tpu.matmul %103, %90, %cst_54 {dimension_numbers = #tpu.dot_dimension_numbers<[1], [0], [0], [1], [0, 0, 1, 1], [], []>} : vector<8x16xf32>, vector<16x8xf32>, vector<8x8xf32> -> vector<8x8xf32>
    %105 = arith.index_cast %c0_i32 : i32 to index
    %c0_55 = arith.constant 0 : index
    %c0_56 = arith.constant 0 : index
    %106 = vector.load %arg10[%105, %c0_55, %c0_56] : memref<4x8x32xf32, #tpu.memory_space<vmem>>, vector<1x8x32xf32>
    %107 = vector.shape_cast %106 : vector<1x8x32xf32> to vector<8x32xf32>
    %cst_57 = arith.constant dense<0.000000e+00> : vector<8x32xf32>
    %108 = tpu.matmul %104, %107, %cst_57 {dimension_numbers = #tpu.dot_dimension_numbers<[1], [0], [0], [1], [0, 0, 1, 1], [], []>} : vector<8x8xf32>, vector<8x32xf32>, vector<8x32xf32> -> vector<8x32xf32>
    %109 = arith.addf %63, %108 : vector<8x32xf32>
    %c1_i32 = arith.constant 1 : i32
    %110 = arith.index_cast %c1_i32 : i32 to index
    %c0_58 = arith.constant 0 : index
    %c0_59 = arith.constant 0 : index
    %111 = vector.load %arg4[%110, %c0_58, %c0_59] : memref<4x32x8xf32, #tpu.memory_space<vmem>>, vector<1x32x8xf32>
    %112 = vector.shape_cast %111 : vector<1x32x8xf32> to vector<32x8xf32>
    %cst_60 = arith.constant dense<0.000000e+00> : vector<8x8xf32>
    %113 = tpu.matmul %62, %112, %cst_60 {dimension_numbers = #tpu.dot_dimension_numbers<[1], [0], [0], [1], [0, 0, 1, 1], [], []>} : vector<8x32xf32>, vector<32x8xf32>, vector<8x8xf32> -> vector<8x8xf32>
    %114 = arith.index_cast %c1_i32 : i32 to index
    %c0_61 = arith.constant 0 : index
    %c0_62 = arith.constant 0 : index
    %115 = vector.load %arg7[%114, %c0_61, %c0_62] : memref<4x1x8xf32, #tpu.memory_space<vmem>>, vector<1x1x8xf32>
    %116 = vector.shape_cast %115 : vector<1x1x8xf32> to vector<1x8xf32>
    %117 = vector.broadcast %116 : vector<1x8xf32> to vector<8x8xf32>
    %118 = arith.addf %113, %117 : vector<8x8xf32>
    %119 = arith.index_cast %c1_i32 : i32 to index
    %c0_63 = arith.constant 0 : index
    %c0_64 = arith.constant 0 : index
    %120 = vector.load %arg5[%119, %c0_63, %c0_64] : memref<4x32x8xf32, #tpu.memory_space<vmem>>, vector<1x32x8xf32>
    %121 = vector.shape_cast %120 : vector<1x32x8xf32> to vector<32x8xf32>
    %cst_65 = arith.constant dense<0.000000e+00> : vector<16x8xf32>
    %122 = tpu.matmul %40, %121, %cst_65 {dimension_numbers = #tpu.dot_dimension_numbers<[1], [0], [0], [1], [0, 0, 1, 1], [], []>} : vector<16x32xf32>, vector<32x8xf32>, vector<16x8xf32> -> vector<16x8xf32>
    %123 = arith.index_cast %c1_i32 : i32 to index
    %c0_66 = arith.constant 0 : index
    %c0_67 = arith.constant 0 : index
    %124 = vector.load %arg8[%123, %c0_66, %c0_67] : memref<4x1x8xf32, #tpu.memory_space<vmem>>, vector<1x1x8xf32>
    %125 = vector.shape_cast %124 : vector<1x1x8xf32> to vector<1x8xf32>
    %126 = vector.broadcast %125 : vector<1x8xf32> to vector<16x8xf32>
    %127 = arith.addf %122, %126 : vector<16x8xf32>
    %128 = arith.index_cast %c1_i32 : i32 to index
    %c0_68 = arith.constant 0 : index
    %c0_69 = arith.constant 0 : index
    %129 = vector.load %arg6[%128, %c0_68, %c0_69] : memref<4x32x8xf32, #tpu.memory_space<vmem>>, vector<1x32x8xf32>
    %130 = vector.shape_cast %129 : vector<1x32x8xf32> to vector<32x8xf32>
    %cst_70 = arith.constant dense<0.000000e+00> : vector<16x8xf32>
    %131 = tpu.matmul %40, %130, %cst_70 {dimension_numbers = #tpu.dot_dimension_numbers<[1], [0], [0], [1], [0, 0, 1, 1], [], []>} : vector<16x32xf32>, vector<32x8xf32>, vector<16x8xf32> -> vector<16x8xf32>
    %132 = arith.index_cast %c1_i32 : i32 to index
    %c0_71 = arith.constant 0 : index
    %c0_72 = arith.constant 0 : index
    %133 = vector.load %arg9[%132, %c0_71, %c0_72] : memref<4x1x8xf32, #tpu.memory_space<vmem>>, vector<1x1x8xf32>
    %134 = vector.shape_cast %133 : vector<1x1x8xf32> to vector<1x8xf32>
    %135 = vector.broadcast %134 : vector<1x8xf32> to vector<16x8xf32>
    %136 = arith.addf %131, %135 : vector<16x8xf32>
    %cst_73 = arith.constant dense<0.000000e+00> : vector<8x16xf32>
    %137 = tpu.matmul %118, %127, %cst_73 {dimension_numbers = #tpu.dot_dimension_numbers<[1], [1], [0], [0], [0, 0, 1, 0], [], []>} : vector<8x8xf32>, vector<16x8xf32>, vector<8x16xf32> -> vector<8x16xf32>
    %cst_74 = arith.constant 0.353553385 : f32
    %138 = vector.broadcast %cst_74 : f32 to vector<8x16xf32>
    %139 = arith.mulf %137, %138 : vector<8x16xf32>
    %cst_75 = arith.constant dense<0xFF800000> : vector<8xf32>
    %140 = vector.multi_reduction <maximumf>, %139, %cst_75 [1] : vector<8x16xf32> to vector<8xf32>
    %141 = vector.shape_cast %140 : vector<8xf32> to vector<8x1xf32>
    %142 = vector.broadcast %141 : vector<8x1xf32> to vector<8x16xf32>
    %143 = arith.subf %139, %142 : vector<8x16xf32>
    %144 = math.exp %143 : vector<8x16xf32>
    %cst_76 = arith.constant dense<0.000000e+00> : vector<8xf32>
    %145 = vector.multi_reduction <add>, %144, %cst_76 [1] : vector<8x16xf32> to vector<8xf32>
    %146 = vector.shape_cast %145 : vector<8xf32> to vector<8x1xf32>
    %147 = tpu.reciprocal %146 : vector<8x1xf32> -> vector<8x1xf32>
    %148 = vector.broadcast %147 : vector<8x1xf32> to vector<8x16xf32>
    %149 = arith.mulf %144, %148 : vector<8x16xf32>
    %cst_77 = arith.constant dense<0.000000e+00> : vector<8x8xf32>
    %150 = tpu.matmul %149, %136, %cst_77 {dimension_numbers = #tpu.dot_dimension_numbers<[1], [0], [0], [1], [0, 0, 1, 1], [], []>} : vector<8x16xf32>, vector<16x8xf32>, vector<8x8xf32> -> vector<8x8xf32>
    %151 = arith.index_cast %c1_i32 : i32 to index
    %c0_78 = arith.constant 0 : index
    %c0_79 = arith.constant 0 : index
    %152 = vector.load %arg10[%151, %c0_78, %c0_79] : memref<4x8x32xf32, #tpu.memory_space<vmem>>, vector<1x8x32xf32>
    %153 = vector.shape_cast %152 : vector<1x8x32xf32> to vector<8x32xf32>
    %cst_80 = arith.constant dense<0.000000e+00> : vector<8x32xf32>
    %154 = tpu.matmul %150, %153, %cst_80 {dimension_numbers = #tpu.dot_dimension_numbers<[1], [0], [0], [1], [0, 0, 1, 1], [], []>} : vector<8x8xf32>, vector<8x32xf32>, vector<8x32xf32> -> vector<8x32xf32>
    %155 = arith.addf %109, %154 : vector<8x32xf32>
    %c2_i32 = arith.constant 2 : i32
    %156 = arith.index_cast %c2_i32 : i32 to index
    %c0_81 = arith.constant 0 : index
    %c0_82 = arith.constant 0 : index
    %157 = vector.load %arg4[%156, %c0_81, %c0_82] : memref<4x32x8xf32, #tpu.memory_space<vmem>>, vector<1x32x8xf32>
    %158 = vector.shape_cast %157 : vector<1x32x8xf32> to vector<32x8xf32>
    %cst_83 = arith.constant dense<0.000000e+00> : vector<8x8xf32>
    %159 = tpu.matmul %62, %158, %cst_83 {dimension_numbers = #tpu.dot_dimension_numbers<[1], [0], [0], [1], [0, 0, 1, 1], [], []>} : vector<8x32xf32>, vector<32x8xf32>, vector<8x8xf32> -> vector<8x8xf32>
    %160 = arith.index_cast %c2_i32 : i32 to index
    %c0_84 = arith.constant 0 : index
    %c0_85 = arith.constant 0 : index
    %161 = vector.load %arg7[%160, %c0_84, %c0_85] : memref<4x1x8xf32, #tpu.memory_space<vmem>>, vector<1x1x8xf32>
    %162 = vector.shape_cast %161 : vector<1x1x8xf32> to vector<1x8xf32>
    %163 = vector.broadcast %162 : vector<1x8xf32> to vector<8x8xf32>
    %164 = arith.addf %159, %163 : vector<8x8xf32>
    %165 = arith.index_cast %c2_i32 : i32 to index
    %c0_86 = arith.constant 0 : index
    %c0_87 = arith.constant 0 : index
    %166 = vector.load %arg5[%165, %c0_86, %c0_87] : memref<4x32x8xf32, #tpu.memory_space<vmem>>, vector<1x32x8xf32>
    %167 = vector.shape_cast %166 : vector<1x32x8xf32> to vector<32x8xf32>
    %cst_88 = arith.constant dense<0.000000e+00> : vector<16x8xf32>
    %168 = tpu.matmul %40, %167, %cst_88 {dimension_numbers = #tpu.dot_dimension_numbers<[1], [0], [0], [1], [0, 0, 1, 1], [], []>} : vector<16x32xf32>, vector<32x8xf32>, vector<16x8xf32> -> vector<16x8xf32>
    %169 = arith.index_cast %c2_i32 : i32 to index
    %c0_89 = arith.constant 0 : index
    %c0_90 = arith.constant 0 : index
    %170 = vector.load %arg8[%169, %c0_89, %c0_90] : memref<4x1x8xf32, #tpu.memory_space<vmem>>, vector<1x1x8xf32>
    %171 = vector.shape_cast %170 : vector<1x1x8xf32> to vector<1x8xf32>
    %172 = vector.broadcast %171 : vector<1x8xf32> to vector<16x8xf32>
    %173 = arith.addf %168, %172 : vector<16x8xf32>
    %174 = arith.index_cast %c2_i32 : i32 to index
    %c0_91 = arith.constant 0 : index
    %c0_92 = arith.constant 0 : index
    %175 = vector.load %arg6[%174, %c0_91, %c0_92] : memref<4x32x8xf32, #tpu.memory_space<vmem>>, vector<1x32x8xf32>
    %176 = vector.shape_cast %175 : vector<1x32x8xf32> to vector<32x8xf32>
    %cst_93 = arith.constant dense<0.000000e+00> : vector<16x8xf32>
    %177 = tpu.matmul %40, %176, %cst_93 {dimension_numbers = #tpu.dot_dimension_numbers<[1], [0], [0], [1], [0, 0, 1, 1], [], []>} : vector<16x32xf32>, vector<32x8xf32>, vector<16x8xf32> -> vector<16x8xf32>
    %178 = arith.index_cast %c2_i32 : i32 to index
    %c0_94 = arith.constant 0 : index
    %c0_95 = arith.constant 0 : index
    %179 = vector.load %arg9[%178, %c0_94, %c0_95] : memref<4x1x8xf32, #tpu.memory_space<vmem>>, vector<1x1x8xf32>
    %180 = vector.shape_cast %179 : vector<1x1x8xf32> to vector<1x8xf32>
    %181 = vector.broadcast %180 : vector<1x8xf32> to vector<16x8xf32>
    %182 = arith.addf %177, %181 : vector<16x8xf32>
    %cst_96 = arith.constant dense<0.000000e+00> : vector<8x16xf32>
    %183 = tpu.matmul %164, %173, %cst_96 {dimension_numbers = #tpu.dot_dimension_numbers<[1], [1], [0], [0], [0, 0, 1, 0], [], []>} : vector<8x8xf32>, vector<16x8xf32>, vector<8x16xf32> -> vector<8x16xf32>
    %cst_97 = arith.constant 0.353553385 : f32
    %184 = vector.broadcast %cst_97 : f32 to vector<8x16xf32>
    %185 = arith.mulf %183, %184 : vector<8x16xf32>
    %cst_98 = arith.constant dense<0xFF800000> : vector<8xf32>
    %186 = vector.multi_reduction <maximumf>, %185, %cst_98 [1] : vector<8x16xf32> to vector<8xf32>
    %187 = vector.shape_cast %186 : vector<8xf32> to vector<8x1xf32>
    %188 = vector.broadcast %187 : vector<8x1xf32> to vector<8x16xf32>
    %189 = arith.subf %185, %188 : vector<8x16xf32>
    %190 = math.exp %189 : vector<8x16xf32>
    %cst_99 = arith.constant dense<0.000000e+00> : vector<8xf32>
    %191 = vector.multi_reduction <add>, %190, %cst_99 [1] : vector<8x16xf32> to vector<8xf32>
    %192 = vector.shape_cast %191 : vector<8xf32> to vector<8x1xf32>
    %193 = tpu.reciprocal %192 : vector<8x1xf32> -> vector<8x1xf32>
    %194 = vector.broadcast %193 : vector<8x1xf32> to vector<8x16xf32>
    %195 = arith.mulf %190, %194 : vector<8x16xf32>
    %cst_100 = arith.constant dense<0.000000e+00> : vector<8x8xf32>
    %196 = tpu.matmul %195, %182, %cst_100 {dimension_numbers = #tpu.dot_dimension_numbers<[1], [0], [0], [1], [0, 0, 1, 1], [], []>} : vector<8x16xf32>, vector<16x8xf32>, vector<8x8xf32> -> vector<8x8xf32>
    %197 = arith.index_cast %c2_i32 : i32 to index
    %c0_101 = arith.constant 0 : index
    %c0_102 = arith.constant 0 : index
    %198 = vector.load %arg10[%197, %c0_101, %c0_102] : memref<4x8x32xf32, #tpu.memory_space<vmem>>, vector<1x8x32xf32>
    %199 = vector.shape_cast %198 : vector<1x8x32xf32> to vector<8x32xf32>
    %cst_103 = arith.constant dense<0.000000e+00> : vector<8x32xf32>
    %200 = tpu.matmul %196, %199, %cst_103 {dimension_numbers = #tpu.dot_dimension_numbers<[1], [0], [0], [1], [0, 0, 1, 1], [], []>} : vector<8x8xf32>, vector<8x32xf32>, vector<8x32xf32> -> vector<8x32xf32>
    %201 = arith.addf %155, %200 : vector<8x32xf32>
    %c3_i32 = arith.constant 3 : i32
    %202 = arith.index_cast %c3_i32 : i32 to index
    %c0_104 = arith.constant 0 : index
    %c0_105 = arith.constant 0 : index
    %203 = vector.load %arg4[%202, %c0_104, %c0_105] : memref<4x32x8xf32, #tpu.memory_space<vmem>>, vector<1x32x8xf32>
    %204 = vector.shape_cast %203 : vector<1x32x8xf32> to vector<32x8xf32>
    %cst_106 = arith.constant dense<0.000000e+00> : vector<8x8xf32>
    %205 = tpu.matmul %62, %204, %cst_106 {dimension_numbers = #tpu.dot_dimension_numbers<[1], [0], [0], [1], [0, 0, 1, 1], [], []>} : vector<8x32xf32>, vector<32x8xf32>, vector<8x8xf32> -> vector<8x8xf32>
    %206 = arith.index_cast %c3_i32 : i32 to index
    %c0_107 = arith.constant 0 : index
    %c0_108 = arith.constant 0 : index
    %207 = vector.load %arg7[%206, %c0_107, %c0_108] : memref<4x1x8xf32, #tpu.memory_space<vmem>>, vector<1x1x8xf32>
    %208 = vector.shape_cast %207 : vector<1x1x8xf32> to vector<1x8xf32>
    %209 = vector.broadcast %208 : vector<1x8xf32> to vector<8x8xf32>
    %210 = arith.addf %205, %209 : vector<8x8xf32>
    %211 = arith.index_cast %c3_i32 : i32 to index
    %c0_109 = arith.constant 0 : index
    %c0_110 = arith.constant 0 : index
    %212 = vector.load %arg5[%211, %c0_109, %c0_110] : memref<4x32x8xf32, #tpu.memory_space<vmem>>, vector<1x32x8xf32>
    %213 = vector.shape_cast %212 : vector<1x32x8xf32> to vector<32x8xf32>
    %cst_111 = arith.constant dense<0.000000e+00> : vector<16x8xf32>
    %214 = tpu.matmul %40, %213, %cst_111 {dimension_numbers = #tpu.dot_dimension_numbers<[1], [0], [0], [1], [0, 0, 1, 1], [], []>} : vector<16x32xf32>, vector<32x8xf32>, vector<16x8xf32> -> vector<16x8xf32>
    %215 = arith.index_cast %c3_i32 : i32 to index
    %c0_112 = arith.constant 0 : index
    %c0_113 = arith.constant 0 : index
    %216 = vector.load %arg8[%215, %c0_112, %c0_113] : memref<4x1x8xf32, #tpu.memory_space<vmem>>, vector<1x1x8xf32>
    %217 = vector.shape_cast %216 : vector<1x1x8xf32> to vector<1x8xf32>
    %218 = vector.broadcast %217 : vector<1x8xf32> to vector<16x8xf32>
    %219 = arith.addf %214, %218 : vector<16x8xf32>
    %220 = arith.index_cast %c3_i32 : i32 to index
    %c0_114 = arith.constant 0 : index
    %c0_115 = arith.constant 0 : index
    %221 = vector.load %arg6[%220, %c0_114, %c0_115] : memref<4x32x8xf32, #tpu.memory_space<vmem>>, vector<1x32x8xf32>
    %222 = vector.shape_cast %221 : vector<1x32x8xf32> to vector<32x8xf32>
    %cst_116 = arith.constant dense<0.000000e+00> : vector<16x8xf32>
    %223 = tpu.matmul %40, %222, %cst_116 {dimension_numbers = #tpu.dot_dimension_numbers<[1], [0], [0], [1], [0, 0, 1, 1], [], []>} : vector<16x32xf32>, vector<32x8xf32>, vector<16x8xf32> -> vector<16x8xf32>
    %224 = arith.index_cast %c3_i32 : i32 to index
    %c0_117 = arith.constant 0 : index
    %c0_118 = arith.constant 0 : index
    %225 = vector.load %arg9[%224, %c0_117, %c0_118] : memref<4x1x8xf32, #tpu.memory_space<vmem>>, vector<1x1x8xf32>
    %226 = vector.shape_cast %225 : vector<1x1x8xf32> to vector<1x8xf32>
    %227 = vector.broadcast %226 : vector<1x8xf32> to vector<16x8xf32>
    %228 = arith.addf %223, %227 : vector<16x8xf32>
    %cst_119 = arith.constant dense<0.000000e+00> : vector<8x16xf32>
    %229 = tpu.matmul %210, %219, %cst_119 {dimension_numbers = #tpu.dot_dimension_numbers<[1], [1], [0], [0], [0, 0, 1, 0], [], []>} : vector<8x8xf32>, vector<16x8xf32>, vector<8x16xf32> -> vector<8x16xf32>
    %cst_120 = arith.constant 0.353553385 : f32
    %230 = vector.broadcast %cst_120 : f32 to vector<8x16xf32>
    %231 = arith.mulf %229, %230 : vector<8x16xf32>
    %cst_121 = arith.constant dense<0xFF800000> : vector<8xf32>
    %232 = vector.multi_reduction <maximumf>, %231, %cst_121 [1] : vector<8x16xf32> to vector<8xf32>
    %233 = vector.shape_cast %232 : vector<8xf32> to vector<8x1xf32>
    %234 = vector.broadcast %233 : vector<8x1xf32> to vector<8x16xf32>
    %235 = arith.subf %231, %234 : vector<8x16xf32>
    %236 = math.exp %235 : vector<8x16xf32>
    %cst_122 = arith.constant dense<0.000000e+00> : vector<8xf32>
    %237 = vector.multi_reduction <add>, %236, %cst_122 [1] : vector<8x16xf32> to vector<8xf32>
    %238 = vector.shape_cast %237 : vector<8xf32> to vector<8x1xf32>
    %239 = tpu.reciprocal %238 : vector<8x1xf32> -> vector<8x1xf32>
    %240 = vector.broadcast %239 : vector<8x1xf32> to vector<8x16xf32>
    %241 = arith.mulf %236, %240 : vector<8x16xf32>
    %cst_123 = arith.constant dense<0.000000e+00> : vector<8x8xf32>
    %242 = tpu.matmul %241, %228, %cst_123 {dimension_numbers = #tpu.dot_dimension_numbers<[1], [0], [0], [1], [0, 0, 1, 1], [], []>} : vector<8x16xf32>, vector<16x8xf32>, vector<8x8xf32> -> vector<8x8xf32>
    %243 = arith.index_cast %c3_i32 : i32 to index
    %c0_124 = arith.constant 0 : index
    %c0_125 = arith.constant 0 : index
    %244 = vector.load %arg10[%243, %c0_124, %c0_125] : memref<4x8x32xf32, #tpu.memory_space<vmem>>, vector<1x8x32xf32>
    %245 = vector.shape_cast %244 : vector<1x8x32xf32> to vector<8x32xf32>
    %cst_126 = arith.constant dense<0.000000e+00> : vector<8x32xf32>
    %246 = tpu.matmul %242, %245, %cst_126 {dimension_numbers = #tpu.dot_dimension_numbers<[1], [0], [0], [1], [0, 0, 1, 1], [], []>} : vector<8x8xf32>, vector<8x32xf32>, vector<8x32xf32> -> vector<8x32xf32>
    %247 = arith.addf %201, %246 : vector<8x32xf32>
    %c4_i32 = arith.constant 4 : i32
    %c0_127 = arith.constant 0 : index
    %c0_128 = arith.constant 0 : index
    %248 = vector.load %arg11[%c0_127, %c0_128] : memref<1x32xf32, #tpu.memory_space<vmem>>, vector<1x32xf32>
    %249 = vector.broadcast %248 : vector<1x32xf32> to vector<8x32xf32>
    %250 = arith.addf %247, %249 : vector<8x32xf32>
    %251 = vector.broadcast %12 : vector<1x32xf32> to vector<8x32xf32>
    %252 = arith.mulf %251, %250 : vector<8x32xf32>
    %253 = arith.addf %6, %252 : vector<8x32xf32>
    %cst_129 = arith.constant dense<0.000000e+00> : vector<8xf32>
    %254 = vector.multi_reduction <add>, %253, %cst_129 [1] : vector<8x32xf32> to vector<8xf32>
    %255 = vector.shape_cast %254 : vector<8xf32> to vector<8x1xf32>
    %cst_130 = arith.constant 3.200000e+01 : f32
    %256 = vector.broadcast %cst_130 : f32 to vector<8x1xf32>
    %257 = arith.divf %255, %256 : vector<8x1xf32>
    %258 = vector.broadcast %257 : vector<8x1xf32> to vector<8x32xf32>
    %259 = arith.subf %253, %258 : vector<8x32xf32>
    %260 = arith.mulf %259, %259 : vector<8x32xf32>
    %cst_131 = arith.constant dense<0.000000e+00> : vector<8xf32>
    %261 = vector.multi_reduction <add>, %260, %cst_131 [1] : vector<8x32xf32> to vector<8xf32>
    %262 = vector.shape_cast %261 : vector<8xf32> to vector<8x1xf32>
    %cst_132 = arith.constant 3.200000e+01 : f32
    %263 = vector.broadcast %cst_132 : f32 to vector<8x1xf32>
    %264 = arith.divf %262, %263 : vector<8x1xf32>
    %cst_133 = arith.constant 9.99999997E-7 : f32
    %265 = vector.broadcast %cst_133 : f32 to vector<8x1xf32>
    %266 = arith.addf %264, %265 : vector<8x1xf32>
    %267 = math.rsqrt %266 : vector<8x1xf32>
    %268 = vector.broadcast %267 : vector<8x1xf32> to vector<8x32xf32>
    %269 = arith.mulf %259, %268 : vector<8x32xf32>
    %cst_134 = arith.constant 1.000000e+00 : f32
    %270 = vector.broadcast %cst_134 : f32 to vector<1x32xf32>
    %271 = arith.addf %270, %16 : vector<1x32xf32>
    %272 = vector.broadcast %271 : vector<1x32xf32> to vector<8x32xf32>
    %273 = arith.mulf %269, %272 : vector<8x32xf32>
    %274 = vector.broadcast %14 : vector<1x32xf32> to vector<8x32xf32>
    %275 = arith.addf %273, %274 : vector<8x32xf32>
    %c0_135 = arith.constant 0 : index
    %c0_136 = arith.constant 0 : index
    %276 = vector.load %arg12[%c0_135, %c0_136] : memref<32x128xf32, #tpu.memory_space<vmem>>, vector<32x128xf32>
    %cst_137 = arith.constant dense<0.000000e+00> : vector<8x128xf32>
    %277 = tpu.matmul %275, %276, %cst_137 {dimension_numbers = #tpu.dot_dimension_numbers<[1], [0], [0], [1], [0, 0, 1, 1], [], []>} : vector<8x32xf32>, vector<32x128xf32>, vector<8x128xf32> -> vector<8x128xf32>
    %c0_138 = arith.constant 0 : index
    %c0_139 = arith.constant 0 : index
    %278 = vector.load %arg13[%c0_138, %c0_139] : memref<1x128xf32, #tpu.memory_space<vmem>>, vector<1x128xf32>
    %279 = vector.broadcast %278 : vector<1x128xf32> to vector<8x128xf32>
    %280 = arith.addf %277, %279 : vector<8x128xf32>
    %cst_140 = arith.constant 5.000000e-01 : f32
    %281 = vector.broadcast %cst_140 : f32 to vector<8x128xf32>
    %282 = arith.mulf %281, %280 : vector<8x128xf32>
    %cst_141 = arith.constant 4.471500e-02 : f32
    %283 = vector.broadcast %cst_141 : f32 to vector<8x128xf32>
    %284 = arith.mulf %283, %280 : vector<8x128xf32>
    %285 = arith.mulf %284, %280 : vector<8x128xf32>
    %286 = arith.mulf %285, %280 : vector<8x128xf32>
    %287 = arith.addf %280, %286 : vector<8x128xf32>
    %cst_142 = arith.constant 0.797884583 : f32
    %288 = vector.broadcast %cst_142 : f32 to vector<8x128xf32>
    %289 = arith.mulf %288, %287 : vector<8x128xf32>
    %290 = math.tanh %289 : vector<8x128xf32>
    %cst_143 = arith.constant 1.000000e+00 : f32
    %291 = vector.broadcast %cst_143 : f32 to vector<8x128xf32>
    %292 = arith.addf %291, %290 : vector<8x128xf32>
    %293 = arith.mulf %282, %292 : vector<8x128xf32>
    %c0_144 = arith.constant 0 : index
    %c0_145 = arith.constant 0 : index
    %294 = vector.load %arg14[%c0_144, %c0_145] : memref<128x32xf32, #tpu.memory_space<vmem>>, vector<128x32xf32>
    %cst_146 = arith.constant dense<0.000000e+00> : vector<8x32xf32>
    %295 = tpu.matmul %293, %294, %cst_146 {dimension_numbers = #tpu.dot_dimension_numbers<[1], [0], [0], [1], [0, 0, 1, 1], [], []>} : vector<8x128xf32>, vector<128x32xf32>, vector<8x32xf32> -> vector<8x32xf32>
    %c0_147 = arith.constant 0 : index
    %c0_148 = arith.constant 0 : index
    %296 = vector.load %arg15[%c0_147, %c0_148] : memref<1x32xf32, #tpu.memory_space<vmem>>, vector<1x32xf32>
    %297 = vector.broadcast %296 : vector<1x32xf32> to vector<8x32xf32>
    %298 = arith.addf %295, %297 : vector<8x32xf32>
    %299 = vector.broadcast %18 : vector<1x32xf32> to vector<8x32xf32>
    %300 = arith.mulf %299, %298 : vector<8x32xf32>
    %301 = arith.addf %253, %300 : vector<8x32xf32>
    %c0_149 = arith.constant 0 : index
    %c0_150 = arith.constant 0 : index
    %c0_151 = arith.constant 0 : index
    %302 = vector.load %arg16[%c0_149, %c0_150, %c0_151] : memref<1x8x32xf32, #tpu.memory_space<vmem>>, vector<1x8x32xf32>
    %303 = vector.shape_cast %302 : vector<1x8x32xf32> to vector<8x32xf32>
    %304 = vector.shape_cast %301 : vector<8x32xf32> to vector<1x8x32xf32>
    tpu.vector_store %arg16[%c0_149, %c0_150, %c0_151], %304 {strides = array<i32>} : memref<1x8x32xf32, #tpu.memory_space<vmem>>, vector<1x8x32xf32>,
    return
  }
  func.func @transform_0(%arg0: i32, %arg1: i32) -> (i32, i32, i32) {
    %c0_i32 = arith.constant 0 : i32
    %c0_i32_0 = arith.constant 0 : i32
    %c0_i32_1 = arith.constant 0 : i32
    return %arg0, %c0_i32, %c0_i32_0 : i32, i32, i32
  }
  func.func @transform_1(%arg0: i32, %arg1: i32) -> (i32, i32, i32, i32) {
    %c0_i32 = arith.constant 0 : i32
    %c0_i32_0 = arith.constant 0 : i32
    %c0_i32_1 = arith.constant 0 : i32
    %c0_i32_2 = arith.constant 0 : i32
    return %arg0, %c0_i32, %c0_i32_0, %c0_i32_1 : i32, i32, i32, i32
  }
  func.func @transform_2(%arg0: i32, %arg1: i32) -> (i32, i32, i32) {
    %c0_i32 = arith.constant 0 : i32
    %c0_i32_0 = arith.constant 0 : i32
    %c0_i32_1 = arith.constant 0 : i32
    %c0_i32_2 = arith.constant 0 : i32
    return %c0_i32, %c0_i32_0, %c0_i32_1 : i32, i32, i32
  }
  func.func @transform_3(%arg0: i32, %arg1: i32) -> (i32, i32, i32) {
    %c0_i32 = arith.constant 0 : i32
    %c0_i32_0 = arith.constant 0 : i32
    %c0_i32_1 = arith.constant 0 : i32
    %c0_i32_2 = arith.constant 0 : i32
    return %c0_i32, %c0_i32_0, %c0_i32_1 : i32, i32, i32
  }
  func.func @transform_4(%arg0: i32, %arg1: i32) -> (i32, i32, i32) {
    %c0_i32 = arith.constant 0 : i32
    %c0_i32_0 = arith.constant 0 : i32
    %c0_i32_1 = arith.constant 0 : i32
    %c0_i32_2 = arith.constant 0 : i32
    return %c0_i32, %c0_i32_0, %c0_i32_1 : i32, i32, i32
  }
  func.func @transform_5(%arg0: i32, %arg1: i32) -> (i32, i32, i32) {
    %c0_i32 = arith.constant 0 : i32
    %c0_i32_0 = arith.constant 0 : i32
    %c0_i32_1 = arith.constant 0 : i32
    %c0_i32_2 = arith.constant 0 : i32
    return %c0_i32, %c0_i32_0, %c0_i32_1 : i32, i32, i32
  }
  func.func @transform_6(%arg0: i32, %arg1: i32) -> (i32, i32, i32) {
    %c0_i32 = arith.constant 0 : i32
    %c0_i32_0 = arith.constant 0 : i32
    %c0_i32_1 = arith.constant 0 : i32
    %c0_i32_2 = arith.constant 0 : i32
    return %c0_i32, %c0_i32_0, %c0_i32_1 : i32, i32, i32
  }
  func.func @transform_7(%arg0: i32, %arg1: i32) -> (i32, i32, i32) {
    %c0_i32 = arith.constant 0 : i32
    %c0_i32_0 = arith.constant 0 : i32
    %c0_i32_1 = arith.constant 0 : i32
    %c0_i32_2 = arith.constant 0 : i32
    return %c0_i32, %c0_i32_0, %c0_i32_1 : i32, i32, i32
  }
  func.func @transform_8(%arg0: i32, %arg1: i32) -> (i32, i32, i32) {
    %c0_i32 = arith.constant 0 : i32
    %c0_i32_0 = arith.constant 0 : i32
    %c0_i32_1 = arith.constant 0 : i32
    %c0_i32_2 = arith.constant 0 : i32
    return %c0_i32, %c0_i32_0, %c0_i32_1 : i32, i32, i32
  }
  func.func @transform_9(%arg0: i32, %arg1: i32) -> (i32, i32) {
    %c0_i32 = arith.constant 0 : i32
    %c0_i32_0 = arith.constant 0 : i32
    %c0_i32_1 = arith.constant 0 : i32
    return %c0_i32, %c0_i32_0 : i32, i32
  }
  func.func @transform_10(%arg0: i32, %arg1: i32) -> (i32, i32) {
    %c0_i32 = arith.constant 0 : i32
    %c0_i32_0 = arith.constant 0 : i32
    %c0_i32_1 = arith.constant 0 : i32
    return %c0_i32, %c0_i32_0 : i32, i32
  }
  func.func @transform_11(%arg0: i32, %arg1: i32) -> (i32, i32) {
    %c0_i32 = arith.constant 0 : i32
    %c0_i32_0 = arith.constant 0 : i32
    %c0_i32_1 = arith.constant 0 : i32
    return %c0_i32, %c0_i32_0 : i32, i32
  }
  func.func @transform_12(%arg0: i32, %arg1: i32) -> (i32, i32) {
    %c0_i32 = arith.constant 0 : i32
    %c0_i32_0 = arith.constant 0 : i32
    %c0_i32_1 = arith.constant 0 : i32
    return %c0_i32, %c0_i32_0 : i32, i32
  }
  func.func @transform_13(%arg0: i32, %arg1: i32) -> (i32, i32) {
    %c0_i32 = arith.constant 0 : i32
    %c0_i32_0 = arith.constant 0 : i32
    %c0_i32_1 = arith.constant 0 : i32
    return %c0_i32, %c0_i32_0 : i32, i32
  }
  func.func @transform_14(%arg0: i32, %arg1: i32) -> (i32, i32, i32) {
    %c0_i32 = arith.constant 0 : i32
    %c0_i32_0 = arith.constant 0 : i32
    return %arg0, %arg1, %c0_i32 : i32, i32, i32
  }
}

</mosaic_0001>

<bundles_post_ra>
// kernel: tpu_custom_call.1
= control target key start
LH: loop header
LB: loop body
LE: loop exit
PB: predicated region body
PF: predicated region fallthrough
CT: control target
= control target key end

     0   :  { %s4426_s0 = inlined_call_operand.vmem [shape: f32[2,16,32], index: 0, kind: input, shape index: {}]   ;;  %s4427_s1 = inlined_call_operand.vmem [shape: f32[2,6,1,32], index: 1, kind: input, shape index: {}]   ;;  %s4428_s2 = inlined_call_operand.vmem [shape: f32[4,32,8], index: 2, kind: input, shape index: {}]   ;;  %s4429_s3 = inlined_call_operand.vmem [shape: f32[4,32,8], index: 3, kind: input, shape index: {}]   ;;  %s4430_s4 = inlined_call_operand.vmem [shape: f32[4,32,8], index: 4, kind: input, shape index: {}]   ;;  %s4431_s5 = inlined_call_operand.vmem [shape: f32[4,1,8], index: 5, kind: input, shape index: {}]   ;;  %s4432_s6 = inlined_call_operand.vmem [shape: f32[4,1,8], index: 6, kind: input, shape index: {}]   ;;  %s4433_s7 = inlined_call_operand.vmem [shape: f32[4,1,8], index: 7, kind: input, shape index: {}]   ;;  %s4434_s8 = inlined_call_operand.vmem [shape: f32[4,8,32], index: 8, kind: input, shape index: {}]   ;;  %s4435_s9 = inlined_call_operand.vmem [shape: f32[1,32], index: 9, kind: input, shape index: {}]   ;;  %s4436_s10 = inlined_call_operand.vmem [shape: f32[32,128], index: 10, kind: input, shape index: {}]   ;;  %s4437_s11 = inlined_call_operand.vmem [shape: f32[1,128], index: 11, kind: input, shape index: {}]   ;;  %s4438_s12 = inlined_call_operand.vmem [shape: f32[128,32], index: 12, kind: input, shape index: {}]   ;;  %s4439_s13 = inlined_call_operand.vmem [shape: f32[1,32], index: 13, kind: input, shape index: {}]   ;;  %s4440_s14 = inlined_call_operand.hbm [shape: f32[2,16,32], index: 14, kind: output, shape index: {}]  }
   0x1   :  { %4449 = sst [smem:[#allocation11_spill]] %s4426_s0 }
   0x2   :  { %4450 = sst [smem:[#allocation12_spill]] %s4427_s1 }
   0x3   :  { %4451 = sst [smem:[#allocation13_spill]] %s4428_s2 }
   0x4   :  { %4452 = sst [smem:[#allocation14_spill]] %s4429_s3 }
   0x5   :  { %4453 = sst [smem:[#allocation15_spill]] %s4440_s14 }
   0x6   :  { %19 = vsyncpa [#allocation3], 0 }
   0x7   :  { %21 = vsyncpa [#allocation3 + $0x1], 0  ;;  %s3838_s29 = smov 0   ;;  %s3840_s30 = smov 0  }
   0x8   :  { %s3842_s15 = smov 0   ;;  %s3844_s16 = smov 0  }
   0x9   :  { %s3846_s17 = smov 0   ;;  %s3848_s18 = smov 0  }
   0xa   :  { %s3850_s19 = smov 0   ;;  %s3852_s20 = smov 0  }
   0xb LB: > { %4454 = sst [smem:[#allocation5_spill]] %s3729_s29  ;;  %s2912_s21 = sadd.s32 4294967295, %s3757_s20   ;;  %s3757_s20 = sphi %s3852_s20, %s27_s20   ;;  %s3753_s19 = sphi %s3850_s19, %s4479_s19   ;;  %s3749_s18 = sphi %s3848_s18, %s4473_s18   ;;  %s3745_s17 = sphi %s3846_s17, %s4478_s17   ;;  %s3741_s16 = sphi %s3844_s16, %s4472_s16   ;;  %s3737_s15 = sphi %s3842_s15, %s4477_s15   ;;  %s3733_s30 = sphi %s3840_s30, %s4476_s30   ;;  %s3729_s29 = sphi %s3838_s29, %s4475_s29  }
   0xc   : > { %4455 = sst [smem:[#allocation6_spill]] %s3749_s18  ;;  %s2913_s22 = sadd.s32 4294967294, %s3757_s20  }
   0xd   : > { %s36_s23 = sadd.s32 1, %s3749_s18  ;;  %s39_s24 = sadd.s32 1, %s3753_s19 }
   0xe   : > { %p37_p0 = scmp.ge.s32.totalorder %s36_s23, 2  ;;  %p362_p1 = scmp.ne.s32.totalorder %s3737_s15, %s3733_s30 }
   0xf   : > { %p363_p2 = scmp.eq.s32.totalorder %s2912_s21, 3  ;;  %p368_p5 = scmp.ne.s32.totalorder %s3733_s30, %s3729_s29 }
  0x10   : > { %s4481_s23 = smov (%p37_p0, %s36_s23), 0  ;;  %s4483_s24 = smov (!%p37_p0, %s39_s24), %s3753_s19 }
  0x11   : > { %4456 = sst [smem:[#allocation7_spill]] %s4481_s23  ;;  %s348_s25 = ssub.s32 %s3749_s18, %s4481_s23 }
  0x12   : > { %p3889_p3 = por %p363_p2, %p362_p1  ;;  %p41_p4 = scmp.ge.s32.totalorder %s4483_s24, 2 }
  0x13   : > { %p369_p6 = scmp.eq.s32.totalorder %s2913_s22, 3  ;;  %p2916_p7 = scmp.ge.s32.totalorder %s3757_s20, 1 }
  0x14   : > { %s4457_s26 = scalar_select %p3889_p3, 1, 0 }
  0x15   : > { %s4485_s24 = smov (%p41_p4, %s4483_s24), 0  ;;  %p3898_p8 = por %p369_p6, %p368_p5 }
  0x16   : > { %4458 = sst [smem:[#allocation8_spill]] %s4457_s26  ;;  %p438_p9 = scmp.lt.s32.totalorder %s3757_s20, 5 }
  0x17   : > { %4459 = sst [smem:[#allocation9_spill]] %s4485_s24  ;;  %s347_s28 = ssub.s32 %s3753_s19, %s4485_s24 }
  0x18   : > { %s4460_s27 = scalar_select %p3898_p8, 1, 0 }
  0x19   : > { %s352_s21 = sadd.s32 1, %s3737_s15  ;;  %s349_s14 = sor.u32 %s348_s25, %s347_s28 }
  0x1a   : > { %4461 = sst [smem:[#allocation10_spill]] %s4460_s27  ;;  %p439_p10 = pnand %p2916_p7, %p438_p9 }
  0x1b   : > { %p350_p11 = scmp.eq.s32.totalorder %s349_s14, 0  ;;  %p488_p12 = scmp.lt.s32.totalorder (!%p439_p10), %s3745_s17, 1  ;;  %vm513_vm0 = vcmask (!%p439_p10), 261120   ;;  %v3759_v24 = vmov (!%p439_p10), 0.0|0.0   ;;  %vm3760_vm1 = vmmov (!%p439_p10), 0   ;;  %v3761_v31 = vmov (!%p439_p10), 0.0  }
  0x1c   : > { %442 = sbr.rel (%p439_p10) target bundleno = 5024 (0x13a0), region = 76  ;;  %s2920_s18 = sshll.u32 (!%p439_p10), %s3741_s16, 3  ;;  %3416 = vmatprep.subr.bf16.mxu0 (!%p439_p10), %v3759_v24  ;;  %3438 = vmatprep.subr.bf16.mxu1 (!%p439_p10), %v3759_v24  ;;  %v543_v34 = vlaneseq (!%p439_p10)  ;;  %v749_v59 = vld [vmem:[%s4430_s4] sm:$0xff] (!%p439_p10)  ;;  %v750_v60 = vld [vmem:[%s4430_s4 + $0x8] sm:$0xff] (!%p439_p10)  ;;  %vm835_vm2 = vcmask (!%p439_p10), 64512   ;;  %vm916_vm4 = vcmask (!%p439_p10), 130048  }
  0x1d   : > { %s3907_s23 = scalar_select %p350_p11, %s3737_s15, %s352_s21  }
  0x1e   : > { %s4462_s0 = sld [smem:[#allocation11_spill]] (!%p439_p10)  ;;  %s4463_s2 = sld [smem:[#allocation13_spill]] (!%p439_p10)  ;;  %3170 = vmatprep.mubr.msk.f32.mxu0 (!%p439_p10), %vm3760_vm1, %v3761_v31  ;;  %3199 = vmatprep.mubr.msk.f32.mxu1 (!%p439_p10), %vm3760_vm1, %v3761_v31  ;;  %v3959_v40 = vshrl.u32 (!%p439_p10), %v543_v34, 7  ;;  %v3430_v63 = vpack.c.bf16 (!%p439_p10), %v750_v60, %v749_v59  ;;  %vm4008_vm3 = vmpackc.low (!%p439_p10), %vm835_vm2, %vm835_vm2  ;;  %v2956_v34 = vld [vmem:[%s4430_s4 + $0x30] sm:$0xff] (!%p439_p10)  ;;  %v1001_v60 = vld [vmem:[%s4434_s8] sm:$0xff] (!%p439_p10) }
  0x1f   : > { %s4464_s3 = sld [smem:[#allocation14_spill]] (!%p439_p10)  ;;  %s4465_s1 = sld [smem:[#allocation12_spill]] (!%p439_p10) }
  0x20   : > { %v545_v45 = vsub.s32 (!%p439_p10), 0, %v3959_v40  ;;  %v2712_v40 = vld [vmem:[%s4438_s12 + $0x20] sm:$0xff] (!%p439_p10)  ;;  %s3035_s27 = sshll.u32 (!%p439_p10), %s3745_s17, 1 }
  0x23   : > { %s3911_s22 = scalar_select %p488_p12, %s3745_s17, 1 }
  0x24   : > { %v573_v21 = vld [vmem:[%s4463_s2] sm:$0xff]  ;;  %v574_v22 = vld [vmem:[%s4463_s2 + $0x8] sm:$0xff]  ;;  %v575_v25 = vld [vmem:[%s4463_s2 + $0x10] sm:$0xff] }
  0x25   : > { %s3039_s29 = sshll.u32 %s3911_s22, 4  ;;  %v3417_v23 = vpack.c.bf16 %v574_v22, %v573_v21  ;;  %v576_v26 = vld [vmem:[%s4463_s2 + $0x18] sm:$0xff]  ;;  %v657_v28 = vld [vmem:[%s4464_s3] sm:$0xff]  ;;  %v658_v29 = vld [vmem:[%s4464_s3 + $0x8] sm:$0xff] }
  0x26   : > { %s492_s24 = scalar_lea.vmem %s4462_s0, %s3039_s29  ;;  %v3420_v27 = vpack.c.bf16 %v576_v26, %v575_v25  ;;  %v3422_v30 = vpack.c.bf16 %v658_v29, %v657_v28  ;;  %v659_v50 = vld [vmem:[%s4464_s3 + $0x10] sm:$0xff]  ;;  %v660_v51 = vld [vmem:[%s4464_s3 + $0x18] sm:$0xff]  ;;  %v2954_v29 = vld [vmem:[%s4430_s4 + $0x20] sm:$0xff] }
  0x27   : > { %s500_s25 = scalar_lea.vmem %s492_s24, %s2920_s18  ;;  %v499_v0 = vld [vmem:[%s492_s24 + $0x8] sm:$0xff]  ;;  %v498_v3 = vld [vmem:[%s492_s24] sm:$0xff]  ;;  %3418 = vmatpush3.bf16.msra.mxu0 %v3417_v23  ;;  %s3562_s24 = smul.u32 6, %s3911_s22  ;;  %v3426_v57 = vpack.c.bf16 %v660_v51, %v659_v50  ;;  %v2941_v26 = vld [vmem:[%s4463_s2 + $0x30] sm:$0xff] }
  0x28   : > { %v3918_v1 = vld [vmem:[%s500_s25] sm:$0xff]  ;;  %v517_v2 = vsel %vm513_vm0, %v499_v0, 0.0  ;;  %v514_v5 = vsel %vm513_vm0, %v498_v3, 0.0  ;;  %3419 = vmatprep.subr.bf16.mxu0 %v3759_v24  ;;  %s2822_s25 = sadd.s32 %s3741_s16, %s3035_s27 }
  0x29   : > { %v558_v4 = vsel %vm513_vm0, %v3918_v1, 0.0  ;;  %518 = vadd.xlane.f32.xlu1 %v517_v2  ;;  %s3957_s28 = scalar_lea.vmem %s4465_s1, %s3562_s24  ;;  %v751_v2 = vld [vmem:[%s4430_s4 + $0x10] sm:$0xff]  ;;  %s485_s24 = sand.u32 1, %s3733_s30  }
  0x2a   : > { %559 = vadd.xlane.f32.xlu0 %v558_v4  ;;  %v2921_v43 = vld [vmem:[%s3957_s28 + $0x1] sm:$0x1]  ;;  %v2926_v49 = vld [vmem:[%s3957_s28] ss:$0 sm:$0xff]  ;;  %s2917_s26 = sshll.u32 %s485_s24, 3  ;;  %s3036_s14 = sshll.u32 %s2822_s25, 7 }
  0x2b   : > { %3421 = vmatpush3.bf16.msra.mxu0 %v3420_v27  ;;  %v541_v44 = vadd.f32 1.0, %v2921_v43  ;;  %v2942_v27 = vld [vmem:[%s4463_s2 + $0x38] sm:$0xff]  ;;  %s487_s29 = scalar_lea.vmem [#allocation2], %s2917_s26  ;;  %s2811_s16 = scalar_lea.sflag [#allocation3], %s485_s24 }
  0x2c   : > { %3423 = vmatprep.subr.bf16.mxu0 %v3422_v30  ;;  %s2826_s18 = sshll.u32 %s487_s29, 4  ;;  %s3762_s26 = smov [#allocation2]   ;;  %s4374_s18 = int_to_ptr.vmem [resolvable:$true] %s2826_s18 }
  0x2d   : > { %v546_v46 = vrot.slane %v541_v44, %v545_v45  ;;  %v2959_v44 = vld [vmem:[%s4433_s7 + $0x1] ss:$0 sm:$0xff]  ;;  %s3667_s27 = sshll.u32 %s3762_s26, 4  ;;  %s3668_s27 = int_to_ptr.vmem [resolvable:$false] %s3667_s27 }
  0x2e   : > { %515 = vadd.xlane.f32.xlu0 %v514_v5  ;;  %s3669_s22 = scalar_lea.vmem %s3668_s27, 256  ;;  %p3670_p2 = scmp.lt.s32.totalorder %s4374_s18, %s3668_s27 }
  0xb6   : > { %v519_v6 = vpop.xlane.xlu1 %518 }
  0xb7   : > { %v560_v7 = vpop.xlane.xlu0 %559  ;;  %v522_v8 = vmul.f32 0.03125, %v519_v6 }
  0xb8   : > { %v561_v9 = vmul.f32 0.03125, %v560_v7 }
  0xb9   : > { %v524_v10 = vsub.f32 %v499_v0, %v522_v8  ;;  %v2929_v8 = vld [vmem:[%s4432_s6] ss:$0 sm:$0xff] }
  0xba   : > { %v562_v11 = vsub.f32 %v3918_v1, %v561_v9 }
  0xbb   : > { %v516_v12 = vpop.xlane.xlu0 %515  ;;  %v526_v15 = vmul.f32 %v524_v10, %v524_v10 }
  0xbc   : > { %v521_v13 = vmul.f32 0.03125, %v516_v12  ;;  %v563_v14 = vmul.f32 %v562_v11, %v562_v11 }
  0xbd   : > { %v530_v18 = vsel %vm513_vm0, %v526_v15, 0.0  ;;  %v2932_v15 = vld [vmem:[%s4433_s7] ss:$0 sm:$0xff] }
  0xbe   : > { %v523_v16 = vsub.f32 %v498_v3, %v521_v13  ;;  %v564_v17 = vsel %vm513_vm0, %v563_v14, 0.0  ;;  %v752_v3 = vld [vmem:[%s4430_s4 + $0x18] sm:$0xff] }
  0xbf   : > { %565 = vadd.xlane.f32.xlu1 %v564_v17  ;;  %v3434_v5 = vpack.c.bf16 %v752_v3, %v751_v2  ;;  %v2940_v17 = vld [vmem:[%s4463_s2 + $0x28] sm:$0xff] }
  0xc0   : > { %v525_v19 = vmul.f32 %v523_v16, %v523_v16 }
  0xc2   : > { %v527_v20 = vsel %vm513_vm0, %v525_v19, 0.0 }
  0xc3   : > { %531 = vadd.xlane.f32.xlu1 %v530_v18  ;;  %528 = vadd.xlane.f32.xlu0 %v527_v20  ;;  %v2927_v18 = vld [vmem:[%s4431_s5] ss:$0 sm:$0xff] }
 0x14c   : > { %v566_v32 = vpop.xlane.xlu1 %565 }
 0x14d   : > { %v567_v33 = vmul.f32 0.03125, %v566_v32  ;;  %v3449_v32 = vpack.c.bf16 %v2942_v27, %v2941_v26  ;;  %v2981_v26 = vld [vmem:[%s4432_s6 + $0x2] ss:$0 sm:$0xff] }
 0x14f   : > { %v568_v35 = vadd.f32 1e-06, %v567_v33 }
 0x150   : > { %v532_v36 = vpop.xlane.xlu1 %531  ;;  %v529_v37 = vpop.xlane.xlu0 %528 }
 0x151   : > { %3637 = vrsqrt.f32 %v568_v35  ;;  %v534_v38 = vmul.f32 0.03125, %v532_v36  ;;  %v533_v39 = vmul.f32 0.03125, %v529_v37  ;;  %v2957_v35 = vld [vmem:[%s4430_s4 + $0x38] sm:$0xff] }
 0x152   : > { %v3463_v36 = vpack.c.bf16 %v2957_v35, %v2956_v34 }
 0x153   : > { %v536_v41 = vadd.f32 1e-06, %v534_v38  ;;  %v535_v42 = vadd.f32 1e-06, %v533_v39 }
 0x155   : > { %3639 = vrsqrt.f32 %v536_v41 }
 0x156   : > { %3641 = vrsqrt.f32 %v535_v42 }
 0x15b   : > { %v3638_v47 = vpop.eup %3637 }
 0x15c   : > { %v570_v48 = vmul.f32 %v3638_v47, %v562_v11 }
 0x15e   : > { %v571_v52 = vmul.f32 %v570_v48, %v546_v46 }
 0x15f   : > { %v3640_v53 = vpop.eup %3639 }
 0x160   : > { %v3642_v54 = vpop.eup %3641  ;;  %v540_v55 = vmul.f32 %v3640_v53, %v524_v10  ;;  %v3972_v56 = vadd.f32 %v2926_v49, %v571_v52 }
 0x161   : > { %v539_v58 = vmul.f32 %v3642_v54, %v523_v16  ;;  %v2939_v16 = vld [vmem:[%s4463_s2 + $0x20] sm:$0xff] }
 0x162   : > { %3171 = vmatmul.mubr.msk.f32.vlgmr.msra.gmra.mrb[0].mxu0 %vm513_vm0, %v3972_v56  ;;  %v549_v62 = vmul.f32 %v546_v46, %v540_v55  ;;  %v3446_v23 = vpack.c.bf16 %v2940_v17, %v2939_v16 }
 0x163   : > { %v548_v61 = vmul.f32 %v546_v46, %v539_v58  ;;  %3425 = vmatpush3.bf16.msra.mxu0 %v3422_v30  ;;  %v2955_v30 = vld [vmem:[%s4430_s4 + $0x28] sm:$0xff] }
 0x164   : > { %3427 = vmatprep.subr.bf16.mxu0 %v3426_v57  ;;  %v3992_v4 = vadd.f32 %v2926_v49, %v549_v62  ;;  %v3459_v33 = vpack.c.bf16 %v2955_v30, %v2954_v29  ;;  %v2947_v58 = vld [vmem:[%s4464_s3 + $0x28] sm:$0xff]  ;;  %v2948_v62 = vld [vmem:[%s4464_s3 + $0x30] sm:$0xff] }
 0x165   : > { %v3982_v0 = vadd.f32 %v2926_v49, %v548_v61 }
 0x167   : > { %3429 = vmatpush3.bf16.msra.mxu0 %v3426_v57  ;;  %3181 = vmatprep.mubr.msk.f32.mxu0 %vm513_vm0, %v3982_v0  ;;  %v2946_v57 = vld [vmem:[%s4464_s3 + $0x20] sm:$0xff] }
 0x168   : > { %3431 = vmatprep.subr.bf16.mxu0 %v3430_v63  ;;  %v3451_v59 = vpack.c.bf16 %v2947_v58, %v2946_v57 }
 0x16a   : > { %3182 = vmatmul.mubr.msk.f32.vlgmr.msra.gmra.mrb[2].mxu0 %vm513_vm0, %v3992_v4 }
 0x16b   : > { %3433 = vmatpush3.bf16.msra.mxu0 %v3430_v63  ;;  %3192 = vmatprep.mubr.msk.f32.mxu0 %vm513_vm0, %v3982_v0  ;;  %v2949_v63 = vld [vmem:[%s4464_s3 + $0x38] sm:$0xff] }
 0x16c   : > { %3435 = vmatprep.subr.bf16.mxu0 %v3434_v5 }
 0x16f   : > { %3437 = vmatpush3.bf16.msra.mxu0 %v3434_v5  ;;  %v3455_v5 = vpack.c.bf16 %v2949_v63, %v2948_v62 }
 0x170   : > { %3442 = vmatprep.subr.bf16.mxu0 %v3759_v24 }
 0x172   : > { %3193 = vmatmul.mubr.msk.f32.vlgmr.msra.gmra.mrb[4].mxu0 %vm513_vm0, %v3992_v4 }
 0x173   : > { %3206 = vmatprep.mubr.msk.f32.mxu0 %vm3760_vm1, %v3761_v31 }
 0x235   : > { %v653_v6 = vpop.f32.mrb[0].mxu0 }
 0x236   : > { %v3172_v7 = vpop.f32.mrb[1].mxu0  ;;  %v654_v25 = vadd.f32 %v2927_v18, %v653_v6  ;;  %v2976_v6 = vld [vmem:[%s4464_s3 + $0x40] sm:$0xff] }
 0x237   : > { %v2977_v7 = vld [vmem:[%s4464_s3 + $0x48] sm:$0xff] }
 0x23d   : > { %v3183_v9 = vpop.f32.mrb[2].mxu0 }
 0x23e   : > { %v746_v10 = vadd.f32 %v3183_v9, %v2929_v8  ;;  %v740_v11 = vpop.f32.mrb[3].mxu0  ;;  %v2978_v9 = vld [vmem:[%s4464_s3 + $0x50] sm:$0xff] }
 0x23f   : > { %v741_v12 = vadd.f32 %v2929_v8, %v740_v11  ;;  %v3480_v8 = vpack.c.bf16 %v2977_v7, %v2976_v6 }
 0x241   : > { %v3439_v14 = vpack.c.bf16 %v746_v10, %v741_v12  ;;  %v2979_v10 = vld [vmem:[%s4464_s3 + $0x58] sm:$0xff] }
 0x242   : > { %v3484_v11 = vpack.c.bf16 %v2979_v10, %v2978_v9  ;;  %v2989_v9 = vld [vmem:[%s4433_s7 + $0x2] ss:$0 sm:$0xff] }
 0x243   : > { %3441 = vmatpush3.bf16.xpose.msk.msra.mxu1 %vm4008_vm3, %v3439_v14 }
 0x244   : > { %3445 = vmatprep.subr.bf16.mxu1 %v3759_v24 }
 0x245   : > { %v3194_v19 = vpop.f32.mrb[4].mxu0 }
 0x246   : > { %v832_v20 = vadd.f32 %v3194_v19, %v2932_v15  ;;  %v826_v21 = vpop.f32.mrb[5].mxu0 }
 0x247   : > { %v827_v22 = vadd.f32 %v2932_v15, %v826_v21  ;;  %v2951_v15 = vld [vmem:[%s4432_s6 + $0x1] ss:$0 sm:$0xff] }
 0x248   : > { %v2944_v21 = vld [vmem:[%s4431_s5 + $0x1] ss:$0 sm:$0xff] }
 0x249   : > { %v3443_v28 = vpack.c.bf16 %v832_v20, %v827_v22 }
 0x24a   : > { %3200 = vmatmul.mubr.msk.f32.vlgmr.msra.gmra.mrb[0].mxu1 %vm835_vm2, %v654_v25 }
 0x24b   : > { %3444 = vmatpush3.bf16.msra.mxu0 %v3443_v28  ;;  %3447 = vmatpush3.bf16.msra.mxu1 %v3446_v23 }
 0x24c   : > { %3448 = vmatprep.subr.bf16.mxu1 %v3759_v24  ;;  %3217 = vmatprep.mubr.msk.f32.mxu1 %vm3760_vm1, %v3761_v31 }
 0x24d   : > { %3452 = vmatprep.subr.bf16.mxu0 %v3451_v59 }
 0x24f   : > { %3450 = vmatpush3.bf16.msra.mxu1 %v3449_v32 }
 0x250   : > { %3460 = vmatprep.subr.bf16.mxu1 %v3459_v33 }
 0x252   : > { %3218 = vmatmul.mubr.msk.f32.vlgmr.msra.gmra.mrb[2].mxu1 %vm513_vm0, %v3972_v56 }
 0x253   : > { %3462 = vmatpush3.bf16.msra.mxu1 %v3459_v33  ;;  %3239 = vmatprep.mubr.msk.f32.mxu1 %vm513_vm0, %v3982_v0 }
 0x254   : > { %3464 = vmatprep.subr.bf16.mxu1 %v3463_v36 }
 0x257   : > { %3466 = vmatpush3.bf16.msra.mxu1 %v3463_v36 }
 0x258   : > { %3261 = vmatprep.subr.mxu1 %v3761_v31 }
 0x25a   : > { %3240 = vmatmul.mubr.msk.f32.vlgmr.msra.gmra.mrb[4].mxu1 %vm513_vm0, %v3992_v4 }
 0x25b   : > { %3263 = vmatprep.mubr.msk.f32.mxu1 %vm3760_vm1, %v3761_v31  ;;  %3262 = vmatpush3.msra.mxu1 %v1001_v60  ;;  %v2986_v60 = vld [vmem:[%s4430_s4 + $0x50] sm:$0xff] }
 0x25c   : > { %3481 = vmatprep.subr.bf16.mxu1 %v3480_v8 }
 0x31d   : > { %v911_v37 = vpop.f32.mrb[0].mxu1 }
 0x31e   : > { %v915_v38 = vmul.f32 0.35355338, %v911_v37  ;;  %v3201_v39 = vpop.f32.mrb[1].mxu1 }
 0x320   : > { %v917_v41 = vsel %vm916_vm4, %v915_v38, -inf }
 0x321   : > { %918 = vmax.xlane.f32.xlu0 %v917_v41 }
 0x325   : > { %v1081_v42 = vpop.f32.mrb[2].mxu1 }
 0x326   : > { %v3219_v43 = vpop.f32.mrb[3].mxu1  ;;  %v1082_v22 = vadd.f32 %v2944_v21, %v1081_v42 }
 0x32d   : > { %v3241_v46 = vpop.f32.mrb[4].mxu1 }
 0x32e   : > { %v1258_v47 = vadd.f32 %v3241_v46, %v2959_v44  ;;  %v1252_v48 = vpop.f32.mrb[5].mxu1 }
 0x32f   : > { %v1253_v49 = vadd.f32 %v2959_v44, %v1252_v48  ;;  %v2969_v48 = vld [vmem:[%s4463_s2 + $0x40] sm:$0xff] }
 0x331   : > { %v3472_v50 = vpack.c.bf16 %v1258_v47, %v1253_v49  ;;  %v2966_v47 = vld [vmem:[%s4434_s8 + $0x8] sm:$0xff] }
 0x332   : > { %v2970_v49 = vld [vmem:[%s4463_s2 + $0x48] sm:$0xff] }
 0x3ae   : > { %v919_v51 = vpop.xlane.xlu0 %918 }
 0x3af   : > { %v920_v52 = vsub.f32 %v915_v38, %v919_v51  ;;  %v2971_v51 = vld [vmem:[%s4463_s2 + $0x50] sm:$0xff] }
 0x3b1   : > { %v921_v53 = vmul.f32 1.442695, %v920_v52  ;;  %v2972_v52 = vld [vmem:[%s4463_s2 + $0x58] sm:$0xff] }
 0x3b2   : > { %v3478_v58 = vpack.c.bf16 %v2972_v52, %v2971_v51 }
 0x3b3   : > { %3643 = vpow2.f32 %v921_v53 }
 0x3bd   : > { %v3644_v54 = vpop.eup %3643 }
 0x3be   : > { %v923_v55 = vsel %vm916_vm4, %v3644_v54, 0.0 }
 0x3bf   : > { %924 = vadd.xlane.f32.xlu1 %v923_v55  ;;  %v2985_v55 = vld [vmem:[%s4430_s4 + $0x48] sm:$0xff] }
 0x44c   : > { %v925_v61 = vpop.xlane.xlu1 %924 }
 0x44d   : > { %3645 = vrcp.f32 %v925_v61  ;;  %v2987_v61 = vld [vmem:[%s4430_s4 + $0x58] sm:$0xff] }
 0x44e   : > { %v3492_v62 = vpack.c.bf16 %v2987_v61, %v2986_v60 }
 0x457   : > { %v3646_v2 = vpop.eup %3645 }
 0x458   : > { %v927_v3 = vmul.f32 %v3646_v2, %v3644_v54  ;;  %v2984_v54 = vld [vmem:[%s4430_s4 + $0x40] sm:$0xff] }
 0x45a   : > { %3207 = vmatmul.mubr.msk.f32.vlgmr.msra.gmra.mrb[6].mxu0 %vm916_vm4, %v927_v3 }
 0x45b   : > { %3454 = vmatpush3.bf16.msra.mxu0 %v3451_v59  ;;  %3228 = vmatprep.mubr.msk.f32.mxu0 %vm513_vm0, %v3982_v0  ;;  %v3488_v59 = vpack.c.bf16 %v2985_v55, %v2984_v54  ;;  %v3018_v54 = vld [vmem:[%s4433_s7 + $0x3] ss:$0 sm:$0xff] }
 0x45c   : > { %3456 = vmatprep.subr.bf16.mxu0 %v3455_v5 }
 0x45f   : > { %3458 = vmatpush3.bf16.msra.mxu0 %v3455_v5  ;;  %v2974_v5 = vld [vmem:[%s4431_s5 + $0x2] ss:$0 sm:$0xff] }
 0x460   : > { %3467 = vmatprep.subr.bf16.mxu0 %v3759_v24 }
 0x462   : > { %3229 = vmatmul.mubr.msk.f32.vlgmr.msra.gmra.mrb[8].mxu0 %vm513_vm0, %v3992_v4 }
 0x463   : > { %3246 = vmatprep.mubr.msk.f32.mxu0 %vm3760_vm1, %v3761_v31 }
 0x52d   : > { %v997_v12 = vpop.f32.mrb[6].mxu0 }
 0x52e   : > { %v3208_v14 = vpop.f32.mrb[7].mxu0  ;;  %3264 = vmatmul.mubr.msk.f32.vlgmr.msra.gmra.mrb[6].mxu1 %vm835_vm2, %v997_v12 }
 0x52f   : > { %3483 = vmatpush3.bf16.msra.mxu1 %v3480_v8  ;;  %3285 = vmatprep.mubr.msk.f32.mxu1 %vm513_vm0, %v3982_v0 }
 0x530   : > { %3485 = vmatprep.subr.bf16.mxu1 %v3484_v11 }
 0x533   : > { %3487 = vmatpush3.bf16.msra.mxu1 %v3484_v11 }
 0x534   : > { %3496 = vmatprep.subr.bf16.mxu1 %v3759_v24 }
 0x535   : > { %v3230_v16 = vpop.f32.mrb[8].mxu0 }
 0x536   : > { %v1170_v17 = vadd.f32 %v3230_v16, %v2951_v15  ;;  %v1164_v18 = vpop.f32.mrb[9].mxu0  ;;  %3286 = vmatmul.mubr.msk.f32.vlgmr.msra.gmra.mrb[8].mxu1 %vm513_vm0, %v3992_v4 }
 0x537   : > { %v1165_v19 = vadd.f32 %v2951_v15, %v1164_v18  ;;  %3303 = vmatprep.mubr.msk.f32.mxu1 %vm3760_vm1, %v3761_v31 }
 0x539   : > { %v3468_v20 = vpack.c.bf16 %v1170_v17, %v1165_v19 }
 0x53b   : > { %3470 = vmatpush3.bf16.xpose.msk.msra.mxu0 %vm4008_vm3, %v3468_v20 }
 0x53c   : > { %3471 = vmatprep.subr.bf16.mxu0 %v3759_v24 }
 0x542   : > { %3247 = vmatmul.mubr.msk.f32.vlgmr.msra.gmra.mrb[10].mxu0 %vm835_vm2, %v1082_v22 }
 0x543   : > { %3473 = vmatpush3.bf16.msra.mxu0 %v3472_v50  ;;  %3253 = vmatprep.mubr.msk.f32.mxu0 %vm3760_vm1, %v3761_v31  ;;  %v3475_v50 = vpack.c.bf16 %v2970_v49, %v2969_v48  ;;  %v3008_v48 = vld [vmem:[%s4464_s3 + $0x78] sm:$0xff] }
 0x544   : > { %3256 = vmatprep.subr.mxu0 %v3761_v31 }
 0x601   : > { %v1569_v23 = vpop.f32.mrb[6].mxu1 }
 0x602   : > { %v3265_v25 = vpop.f32.mrb[7].mxu1 }
 0x609   : > { %v3287_v27 = vpop.f32.mrb[8].mxu1 }
 0x60a   : > { %v1741_v28 = vadd.f32 %v3287_v27, %v2981_v26  ;;  %v1735_v29 = vpop.f32.mrb[9].mxu1 }
 0x60b   : > { %v1736_v30 = vadd.f32 %v2981_v26, %v1735_v29  ;;  %v2996_v26 = vld [vmem:[%s4434_s8 + $0x10] sm:$0xff]  ;;  %v2999_v29 = vld [vmem:[%s4463_s2 + $0x68] sm:$0xff] }
 0x60d   : > { %v3497_v32 = vpack.c.bf16 %v1741_v28, %v1736_v30  ;;  %v2998_v28 = vld [vmem:[%s4463_s2 + $0x60] sm:$0xff] }
 0x60f   : > { %3499 = vmatpush3.bf16.xpose.msk.msra.mxu1 %vm4008_vm3, %v3497_v32  ;;  %v3504_v32 = vpack.c.bf16 %v2999_v29, %v2998_v28  ;;  %v3028_v29 = vld [vmem:[%s3957_s28 + $0x2] ss:$0 sm:$0xff] }
 0x610   : > { %3313 = vmatprep.subr.mxu1 %v3761_v31 }
 0x615   : > { %v1336_v33 = vpop.f32.mrb[10].mxu0 }
 0x616   : > { %v1340_v34 = vmul.f32 0.35355338, %v1336_v33  ;;  %v3248_v35 = vpop.f32.mrb[11].mxu0 }
 0x617   : > { %v3001_v35 = vld [vmem:[%s4463_s2 + $0x78] sm:$0xff] }
 0x618   : > { %v1341_v36 = vsel %vm916_vm4, %v1340_v34, -inf }
 0x619   : > { %1342 = vmax.xlane.f32.xlu0 %v1341_v36  ;;  %v3013_v36 = vld [vmem:[%s4430_s4 + $0x60] sm:$0xff] }
 0x6a6   : > { %v1343_v37 = vpop.xlane.xlu0 %1342 }
 0x6a7   : > { %v1344_v38 = vsub.f32 %v1340_v34, %v1343_v37  ;;  %v3000_v34 = vld [vmem:[%s4463_s2 + $0x70] sm:$0xff]  ;;  %v3014_v37 = vld [vmem:[%s4430_s4 + $0x68] sm:$0xff] }
 0x6a9   : > { %v1345_v39 = vmul.f32 1.442695, %v1344_v38  ;;  %v3507_v38 = vpack.c.bf16 %v3001_v35, %v3000_v34 }
 0x6ab   : > { %3647 = vpow2.f32 %v1345_v39  ;;  %v3517_v39 = vpack.c.bf16 %v3014_v37, %v3013_v36 }
 0x6b5   : > { %v3648_v41 = vpop.eup %3647 }
 0x6b6   : > { %v1347_v42 = vsel %vm916_vm4, %v3648_v41, 0.0 }
 0x6b7   : > { %1348 = vadd.xlane.f32.xlu1 %v1347_v42  ;;  %v3016_v42 = vld [vmem:[%s4430_s4 + $0x78] sm:$0xff] }
 0x744   : > { %v1349_v43 = vpop.xlane.xlu1 %1348 }
 0x745   : > { %3649 = vrcp.f32 %v1349_v43 }
 0x74f   : > { %v3650_v44 = vpop.eup %3649 }
 0x750   : > { %v1351_v46 = vmul.f32 %v3650_v44, %v3648_v41  ;;  %v3015_v41 = vld [vmem:[%s4430_s4 + $0x70] sm:$0xff]  ;;  %v3005_v44 = vld [vmem:[%s4464_s3 + $0x60] sm:$0xff] }
 0x751   : > { %v3521_v43 = vpack.c.bf16 %v3016_v42, %v3015_v41  ;;  %v2617_v42 = vld [vmem:[%s4436_s10 + $0x10] sm:$0xff] }
 0x752   : > { %3254 = vmatmul.mubr.msk.f32.vlgmr.msra.gmra.mrb[12].mxu0 %vm916_vm4, %v1351_v46 }
 0x753   : > { %3257 = vmatpush3.msra.mxu0 %v2966_v47  ;;  %3258 = vmatprep.mubr.msk.f32.mxu0 %vm3760_vm1, %v3761_v31  ;;  %v3007_v47 = vld [vmem:[%s4464_s3 + $0x70] sm:$0xff] }
 0x754   : > { %3474 = vmatprep.subr.bf16.mxu0 %v3759_v24  ;;  %v3513_v49 = vpack.c.bf16 %v3008_v48, %v3007_v47 }
 0x825   : > { %v1421_v53 = vpop.f32.mrb[12].mxu0 }
 0x826   : > { %v3255_v57 = vpop.f32.mrb[13].mxu0  ;;  %3259 = vmatmul.mubr.msk.f32.vlgmr.msra.gmra.mrb[14].mxu0 %vm835_vm2, %v1421_v53 }
 0x827   : > { %3476 = vmatpush3.bf16.msra.mxu0 %v3475_v50  ;;  %3274 = vmatprep.mubr.msk.f32.mxu0 %vm3760_vm1, %v3761_v31 }
 0x828   : > { %3477 = vmatprep.subr.bf16.mxu0 %v3759_v24 }
 0x82b   : > { %3479 = vmatpush3.bf16.msra.mxu0 %v3478_v58 }
 0x82c   : > { %3489 = vmatprep.subr.bf16.mxu0 %v3488_v59 }
 0x82e   : > { %3275 = vmatmul.mubr.msk.f32.vlgmr.msra.gmra.mrb[16].mxu0 %vm513_vm0, %v3972_v56 }
 0x82f   : > { %3491 = vmatpush3.bf16.msra.mxu0 %v3488_v59  ;;  %3296 = vmatprep.mubr.msk.f32.mxu0 %vm513_vm0, %v3982_v0 }
 0x830   : > { %3493 = vmatprep.subr.bf16.mxu0 %v3492_v62 }
 0x833   : > { %3495 = vmatpush3.bf16.msra.mxu0 %v3492_v62 }
 0x834   : > { %3500 = vmatprep.subr.bf16.mxu0 %v3759_v24 }
 0x836   : > { %3297 = vmatmul.mubr.msk.f32.vlgmr.msra.gmra.mrb[18].mxu0 %vm513_vm0, %v3992_v4 }
 0x837   : > { %3310 = vmatprep.mubr.msk.f32.mxu0 %vm3760_vm1, %v3761_v31 }
 0x8f9   : > { %v1496_v63 = vpop.f32.mrb[14].mxu0 }
 0x8fa   : > { %v4171_v2 = vadd.f32 %v1569_v23, %v1496_v63  ;;  %v3260_v3 = vpop.f32.mrb[15].mxu0 }
 0x901   : > { %v1652_v6 = vpop.f32.mrb[16].mxu0 }
 0x902   : > { %v1653_v7 = vadd.f32 %v2974_v5, %v1652_v6  ;;  %v3276_v8 = vpop.f32.mrb[17].mxu0 }
 0x903   : > { %v3003_v8 = vld [vmem:[%s4431_s5 + $0x3] ss:$0 sm:$0xff] }
 0x904   : > { %3304 = vmatmul.mubr.msk.f32.vlgmr.msra.gmra.mrb[10].mxu1 %vm835_vm2, %v1653_v7 }
 0x905   : > { %3315 = vmatprep.mubr.msk.f32.mxu1 %vm3760_vm1, %v3761_v31  ;;  %3314 = vmatpush3.msra.mxu1 %v2996_v26  ;;  %v3027_v26 = vld [vmem:[%s4435_s9] ss:$0 sm:$0xff] }
 0x909   : > { %v3298_v10 = vpop.f32.mrb[18].mxu0 }
 0x90a   : > { %v1829_v11 = vadd.f32 %v3298_v10, %v2989_v9  ;;  %v1823_v12 = vpop.f32.mrb[19].mxu0 }
 0x90b   : > { %v1824_v14 = vadd.f32 %v2989_v9, %v1823_v12 }
 0x90d   : > { %v3501_v15 = vpack.c.bf16 %v1829_v11, %v1824_v14 }
 0x90f   : > { %3502 = vmatpush3.bf16.msra.mxu0 %v3501_v15 }
 0x910   : > { %3503 = vmatprep.subr.bf16.mxu0 %v3759_v24 }
 0x9d7   : > { %v1907_v16 = vpop.f32.mrb[10].mxu1 }
 0x9d8   : > { %v1911_v17 = vmul.f32 0.35355338, %v1907_v16  ;;  %v3305_v18 = vpop.f32.mrb[11].mxu1 }
 0x9d9   : > { %v3025_v18 = vld [vmem:[%s4434_s8 + $0x18] sm:$0xff] }
 0x9da   : > { %v1912_v19 = vsel %vm916_vm4, %v1911_v17, -inf }
 0x9db   : > { %1913 = vmax.xlane.f32.xlu0 %v1912_v19 }
 0xa68   : > { %v1914_v20 = vpop.xlane.xlu0 %1913 }
 0xa69   : > { %v1915_v21 = vsub.f32 %v1911_v17, %v1914_v20 }
 0xa6b   : > { %v1916_v22 = vmul.f32 1.442695, %v1915_v21 }
 0xa6d   : > { %3651 = vpow2.f32 %v1916_v22 }
 0xa77   : > { %v3652_v23 = vpop.eup %3651 }
 0xa78   : > { %v1918_v25 = vsel %vm916_vm4, %v3652_v23, 0.0 }
 0xa79   : > { %1919 = vadd.xlane.f32.xlu1 %v1918_v25 }
 0xb06   : > { %v1920_v27 = vpop.xlane.xlu1 %1919 }
 0xb07   : > { %3653 = vrcp.f32 %v1920_v27 }
 0xb11   : > { %v3654_v30 = vpop.eup %3653 }
 0xb12   : > { %v1922_v33 = vmul.f32 %v3654_v30, %v3652_v23 }
 0xb14   : > { %3311 = vmatmul.mubr.msk.f32.vlgmr.msra.gmra.mrb[20].mxu0 %vm916_vm4, %v1922_v33 }
 0xb15   : > { %3505 = vmatpush3.bf16.msra.mxu0 %v3504_v32  ;;  %3326 = vmatprep.mubr.msk.f32.mxu0 %vm3760_vm1, %v3761_v31 }
 0xb16   : > { %3506 = vmatprep.subr.bf16.mxu0 %v3759_v24 }
 0xb19   : > { %3508 = vmatpush3.bf16.msra.mxu0 %v3507_v38 }
 0xb1a   : > { %3518 = vmatprep.subr.bf16.mxu0 %v3517_v39 }
 0xb1c   : > { %3327 = vmatmul.mubr.msk.f32.vlgmr.msra.gmra.mrb[22].mxu0 %vm513_vm0, %v3972_v56  ;;  %v3006_v56 = vld [vmem:[%s4464_s3 + $0x68] sm:$0xff]  ;;  %s4469_s3 = sld [smem:[#allocation15_spill]] }
 0xb1d   : > { %3520 = vmatpush3.bf16.msra.mxu0 %v3517_v39  ;;  %3348 = vmatprep.mubr.msk.f32.mxu0 %vm513_vm0, %v3982_v0  ;;  %v3509_v46 = vpack.c.bf16 %v3006_v56, %v3005_v44  ;;  %v2615_v39 = vld [vmem:[%s4436_s10] sm:$0xff] }
 0xb1e   : > { %3522 = vmatprep.subr.bf16.mxu0 %v3521_v43  ;;  %v2708_v56 = vld [vmem:[%s4438_s12] sm:$0xff] }
 0xb1f   : > { %3510 = vmatprep.subr.bf16.mxu1 %v3509_v46 }
 0xb21   : > { %3524 = vmatpush3.bf16.msra.mxu0 %v3521_v43  ;;  %v2618_v43 = vld [vmem:[%s4436_s10 + $0x18] sm:$0xff] }
 0xb22   : > { %3529 = vmatprep.subr.bf16.mxu0 %v3759_v24  ;;  %v3536_v44 = vpack.c.bf16 %v2618_v43, %v2617_v42  ;;  %s4372_s17 = scalar_lea.hbm %s4469_s3, %s3036_s14 }
 0xb24   : > { %3349 = vmatmul.mubr.msk.f32.vlgmr.msra.gmra.mrb[24].mxu0 %vm513_vm0, %v3992_v4 }
 0xb25   : > { %3362 = vmatprep.mubr.msk.f32.mxu0 %vm3760_vm1, %v3761_v31 }
 0xbe7   : > { %v1992_v50 = vpop.f32.mrb[20].mxu0 }
 0xbe8   : > { %v3312_v51 = vpop.f32.mrb[21].mxu0  ;;  %3316 = vmatmul.mubr.msk.f32.vlgmr.msra.gmra.mrb[12].mxu1 %vm835_vm2, %v1992_v50 }
 0xbe9   : > { %3512 = vmatpush3.bf16.msra.mxu1 %v3509_v46  ;;  %3337 = vmatprep.mubr.msk.f32.mxu1 %vm513_vm0, %v3982_v0  ;;  %v2709_v46 = vld [vmem:[%s4438_s12 + $0x8] sm:$0xff]  ;;  %v2924_v51 = vld [vmem:[%s3957_s28 + $0x4] sm:$0x1] }
 0xbea   : > { %3514 = vmatprep.subr.bf16.mxu1 %v3513_v49  ;;  %v3539_v47 = vpack.c.bf16 %v2709_v46, %v2708_v56 }
 0xbed   : > { %3516 = vmatpush3.bf16.msra.mxu1 %v3513_v49 }
 0xbee   : > { %3525 = vmatprep.subr.bf16.mxu1 %v3759_v24 }
 0xbef   : > { %v2151_v52 = vpop.f32.mrb[22].mxu0 }
 0xbf0   : > { %v3328_v53 = vpop.f32.mrb[23].mxu0  ;;  %3338 = vmatmul.mubr.msk.f32.vlgmr.msra.gmra.mrb[14].mxu1 %vm513_vm0, %v3992_v4  ;;  %v3010_v4 = vld [vmem:[%s4432_s6 + $0x3] ss:$0 sm:$0xff] }
 0xbf1   : > { %3355 = vmatprep.mubr.msk.f32.mxu1 %vm3760_vm1, %v3761_v31 }
 0xbf7   : > { %v3350_v55 = vpop.f32.mrb[24].mxu0 }
 0xbf8   : > { %v2328_v57 = vadd.f32 %v3350_v55, %v3018_v54  ;;  %v2322_v58 = vpop.f32.mrb[25].mxu0 }
 0xbf9   : > { %v2323_v0 = vadd.f32 %v3018_v54, %v2322_v58 }
 0xbfb   : > { %v3530_v59 = vpack.c.bf16 %v2328_v57, %v2323_v0  ;;  %v3029_v57 = vld [vmem:[%s3957_s28 + $0x3] ss:$0 sm:$0xff] }
 0xbfd   : > { %3531 = vmatpush3.bf16.msra.mxu0 %v3530_v59  ;;  %v2710_v59 = vld [vmem:[%s4438_s12 + $0x10] sm:$0xff] }
 0xbfe   : > { %3532 = vmatprep.subr.bf16.mxu0 %v3759_v24 }
 0xcbb   : > { %v2067_v60 = vpop.f32.mrb[12].mxu1 }
 0xcbc   : > { %v2071_v61 = vadd.f32 %v2067_v60, %v4171_v2  ;;  %v3317_v62 = vpop.f32.mrb[13].mxu1  ;;  %v2152_v2 = vadd.f32 %v3003_v8, %v2151_v52  ;;  %v2600_v52 = vadd.f32 1.0, %v2924_v51  ;;  %v2711_v60 = vld [vmem:[%s4438_s12 + $0x18] sm:$0xff]  ;;  %v2718_v8 = vld [vmem:[%s4438_s12 + $0x50] sm:$0xff] }
 0xcbe   : > { %v2605_v53 = vrot.slane %v2600_v52, %v545_v45  ;;  %v2713_v45 = vld [vmem:[%s4438_s12 + $0x28] sm:$0xff] }
 0xcbf   : > { %v3545_v62 = vpack.c.bf16 %v2713_v45, %v2712_v40 }
 0xcc3   : > { %v3339_v63 = vpop.f32.mrb[14].mxu1 }
 0xcc4   : > { %v2240_v3 = vadd.f32 %v3339_v63, %v3010_v4  ;;  %v2234_v5 = vpop.f32.mrb[15].mxu1  ;;  %v2715_v63 = vld [vmem:[%s4438_s12 + $0x38] sm:$0xff] }
 0xcc5   : > { %v2235_v6 = vadd.f32 %v3010_v4, %v2234_v5  ;;  %v2714_v4 = vld [vmem:[%s4438_s12 + $0x30] sm:$0xff]  ;;  %v2716_v5 = vld [vmem:[%s4438_s12 + $0x40] sm:$0xff] }
 0xcc7   : > { %v3526_v7 = vpack.c.bf16 %v2240_v3, %v2235_v6  ;;  %v3548_v3 = vpack.c.bf16 %v2715_v63, %v2714_v4  ;;  %v2717_v6 = vld [vmem:[%s4438_s12 + $0x48] sm:$0xff] }
 0xcc9   : > { %3528 = vmatpush3.bf16.xpose.msk.msra.mxu1 %vm4008_vm3, %v3526_v7  ;;  %v3551_v7 = vpack.c.bf16 %v2717_v6, %v2716_v5 }
 0xcca   : > { %3365 = vmatprep.subr.mxu1 %v3761_v31 }
 0xcd0   : > { %3356 = vmatmul.mubr.msk.f32.vlgmr.msra.gmra.mrb[16].mxu1 %vm835_vm2, %v2152_v2  ;;  %v2719_v2 = vld [vmem:[%s4438_s12 + $0x58] sm:$0xff] }
 0xcd1   : > { %3367 = vmatprep.mubr.msk.f32.mxu1 %vm3760_vm1, %v3761_v31  ;;  %3366 = vmatpush3.msra.mxu1 %v3025_v18 }
 0xcd2   : > { %3538 = vmatprep.subr.bf16.mxu1 %v3759_v24 }
 0xda3   : > { %v2406_v9 = vpop.f32.mrb[16].mxu1 }
 0xda4   : > { %v2410_v10 = vmul.f32 0.35355338, %v2406_v9  ;;  %v3357_v11 = vpop.f32.mrb[17].mxu1  ;;  %v3554_v9 = vpack.c.bf16 %v2719_v2, %v2718_v8 }
 0xda5   : > { %v2721_v11 = vld [vmem:[%s4438_s12 + $0x68] sm:$0xff] }
 0xda6   : > { %v2411_v12 = vsel %vm916_vm4, %v2410_v10, -inf }
 0xda7   : > { %2412 = vmax.xlane.f32.xlu0 %v2411_v12 }
 0xe34   : > { %v2413_v13 = vpop.xlane.xlu0 %2412 }
 0xe35   : > { %v2414_v14 = vsub.f32 %v2410_v10, %v2413_v13  ;;  %v2720_v10 = vld [vmem:[%s4438_s12 + $0x60] sm:$0xff]  ;;  %v2722_v13 = vld [vmem:[%s4438_s12 + $0x70] sm:$0xff] }
 0xe36   : > { %v3557_v12 = vpack.c.bf16 %v2721_v11, %v2720_v10 }
 0xe37   : > { %v2415_v15 = vmul.f32 1.442695, %v2414_v14  ;;  %v2723_v14 = vld [vmem:[%s4438_s12 + $0x78] sm:$0xff] }
 0xe39   : > { %3655 = vpow2.f32 %v2415_v15  ;;  %v3560_v15 = vpack.c.bf16 %v2723_v14, %v2722_v13 }
 0xe43   : > { %v3656_v16 = vpop.eup %3655 }
 0xe44   : > { %v2417_v17 = vsel %vm916_vm4, %v3656_v16, 0.0 }
 0xe45   : > { %2418 = vadd.xlane.f32.xlu1 %v2417_v17 }
 0xed2   : > { %v2419_v19 = vpop.xlane.xlu1 %2418 }
 0xed3   : > { %3657 = vrcp.f32 %v2419_v19 }
 0xedd   : > { %v3658_v20 = vpop.eup %3657 }
 0xede   : > { %v2421_v21 = vmul.f32 %v3658_v20, %v3656_v16  ;;  %v3030_v16 = vld [vmem:[%s4437_s11] ss:$0 sm:$0xff] }
 0xee0   : > { %3363 = vmatmul.mubr.msk.f32.vlgmr.msra.gmra.mrb[26].mxu0 %vm916_vm4, %v2421_v21 }
 0xee1   : > { %3378 = vmatprep.mubr.msk.f32.mxu0 %vm3760_vm1, %v3761_v31 }
 0xfb3   : > { %v2491_v22 = vpop.f32.mrb[26].mxu0 }
 0xfb4   : > { %v3364_v23 = vpop.f32.mrb[27].mxu0  ;;  %3368 = vmatmul.mubr.msk.f32.vlgmr.msra.gmra.mrb[18].mxu1 %vm835_vm2, %v2491_v22 }
 0xfb5   : > { %3413 = vmatprep.mubr.msk.f32.mxu1 %vm3760_vm1, %v3761_v31  ;;  %3540 = vmatpush3.bf16.msra.mxu1 %v3539_v47 }
 0xfb6   : > { %3541 = vmatprep.subr.bf16.mxu1 %v3759_v24 }
0x1087   : > { %v2566_v25 = vpop.f32.mrb[18].mxu1 }
0x1088   : > { %v2570_v27 = vadd.f32 %v2566_v25, %v2071_v61  ;;  %v3369_v28 = vpop.f32.mrb[19].mxu1  ;;  %v3542_v61 = vpack.c.bf16 %v2711_v60, %v2710_v59 }
0x108a   : > { %v2578_v30 = vadd.f32 %v3027_v26, %v2570_v27  ;;  %3543 = vmatpush3.bf16.msra.mxu1 %v3542_v61 }
0x108b   : > { %3544 = vmatprep.subr.bf16.mxu1 %v3759_v24 }
0x108c   : > { %v2585_v32 = vmul.f32 %v3028_v29, %v2578_v30  ;;  %v3032_v29 = vld [vmem:[%s4439_s13] ss:$0 sm:$0xff]  ;;  %v3033_v30 = vld [vmem:[%s3957_s28 + $0x5] ss:$0 sm:$0xff]  ;;  %s3663_s28 = scalar_lea.vmem %s4374_s18, 128 }
0x108d   : > { %p3664_p13 = scmp.ne.s32.totalorder %s4374_s18, %s3663_s28  ;;  %p3671_p4 = scmp.lt.s32.totalorder %s3669_s22, %s3663_s28 }
0x108e   : > { %v4279_v33 = vadd.f32 %v2585_v32, %v3918_v1  ;;  %v2616_v1 = vld [vmem:[%s4436_s10 + $0x8] sm:$0xff]  ;;  %3546 = vmatpush3.bf16.msra.mxu1 %v3545_v62 }
0x108f   : > { %v3533_v41 = vpack.c.bf16 %v2616_v1, %v2615_v39  ;;  %3547 = vmatprep.subr.bf16.mxu1 %v3759_v24  ;;  %p3665_p0 = pnand %p3664_p13, %p3889_p3  ;;  %p3672_p5 = por %p3671_p4, %p3670_p2 }
0x1090   : > { %v2587_v34 = vsel %vm513_vm0, %v4279_v33, 0.0 }
0x1091   : > { %2588 = vadd.xlane.f32.xlu0 %v2587_v34  ;;  %3534 = vmatpush3.bf16.msra.mxu0 %v3533_v41  ;;  %p3666_p1 = pneg %p3665_p0 }
0x1092   : > { %3535 = vmatprep.subr.bf16.mxu0 %v3759_v24  ;;  %3549 = vmatpush3.bf16.msra.mxu1 %v3548_v3 }
0x1093   : > { %3550 = vmatprep.subr.bf16.mxu1 %v3759_v24  ;;  %p3673_p6 = pnand %p3672_p5, %p3666_p1 }
0x1095   : > { %3537 = vmatpush3.bf16.msra.mxu0 %v3536_v44 }
0x1096   : > { %3552 = vmatpush3.bf16.msra.mxu1 %v3551_v7 }
0x1097   : > { %3553 = vmatprep.subr.bf16.mxu1 %v3759_v24 }
0x109a   : > { %3555 = vmatpush3.bf16.msra.mxu1 %v3554_v9 }
0x109b   : > { %3556 = vmatprep.subr.bf16.mxu1 %v3759_v24 }
0x109e   : > { %3558 = vmatpush3.bf16.msra.mxu1 %v3557_v12 }
0x109f   : > { %3559 = vmatprep.subr.bf16.mxu1 %v3759_v24 }
0x10a2   : > { %3561 = vmatpush3.bf16.msra.mxu1 %v3560_v15 }
0x111e   : > { %v2589_v35 = vpop.xlane.xlu0 %2588 }
0x111f   : > { %v2590_v36 = vmul.f32 0.03125, %v2589_v35 }
0x1121   : > { %v2591_v31 = vsub.f32 %v4279_v33, %v2590_v36 }
0x1123   : > { %v2592_v37 = vmul.f32 %v2591_v31, %v2591_v31 }
0x1125   : > { %v2593_v38 = vsel %vm513_vm0, %v2592_v37, 0.0 }
0x1126   : > { %2594 = vadd.xlane.f32.xlu1 %v2593_v38 }
0x11b3   : > { %v2595_v48 = vpop.xlane.xlu1 %2594 }
0x11b4   : > { %v2596_v49 = vmul.f32 0.03125, %v2595_v48 }
0x11b6   : > { %v2597_v50 = vadd.f32 1e-06, %v2596_v49 }
0x11b8   : > { %3659 = vrsqrt.f32 %v2597_v50 }
0x11c2   : > { %v3660_v54 = vpop.eup %3659 }
0x11c3   : > { %v2599_v55 = vmul.f32 %v3660_v54, %v2591_v31 }
0x11c5   : > { %v2607_v58 = vmul.f32 %v2605_v53, %v2599_v55 }
0x11c7   : > { %v2614_v0 = vadd.f32 %v3029_v57, %v2607_v58 }
0x11c9   : > { %3379 = vmatmul.mubr.msk.f32.vlgmr.msra.gmra.mrb[28].mxu0 %vm513_vm0, %v2614_v0 }
0x129c   : > { %v2695_v17 = vpop.f32.mrb[28].mxu0 }
0x129d   : > { %v2696_v18 = vadd.f32 %v3030_v16, %v2695_v17  ;;  %v3380_v19 = vpop.f32.mrb[29].mxu0 }
0x129f   : > { %v2700_v20 = vmul.f32 0.044715, %v2696_v18  ;;  %v2699_v24 = vmul.f32 0.5, %v2696_v18 }
0x12a1   : > { %v2701_v21 = vmul.f32 %v2700_v20, %v2696_v18 }
0x12a3   : > { %v2702_v22 = vmul.f32 %v2701_v21, %v2696_v18 }
0x12a5   : > { %v2703_v23 = vadd.f32 %v2702_v22, %v2696_v18 }
0x12a7   : > { %v2704_v25 = vmul.f32 0.7978846, %v2703_v23 }
0x12a9   : > { %3661 = vtanh.f32 %v2704_v25 }
0x12b3   : > { %v3662_v26 = vpop.eup %3661 }
0x12b4   : > { %v2706_v27 = vadd.f32 1.0, %v3662_v26 }
0x12b6   : > { %v2707_v28 = vmul.f32 %v2706_v27, %v2699_v24 }
0x12b8   : > { %3414 = vmatmul.mubr.f32.vlgmr.msra.gmra.mrb[20].mxu1 %v2707_v28 }
0x138b   : > { %v2797_v32 = vpop.f32.mrb[20].mxu1 }
0x138c   : > { %v2798_v34 = vadd.f32 %v3032_v29, %v2797_v32  ;;  %v3415_v35 = vpop.f32.mrb[21].mxu1 }
0x138e   : > { %v2807_v36 = vmul.f32 %v3033_v30, %v2798_v34 }
0x1390   : > { %v2808_v31 = vadd.f32 %v2807_v36, %v4279_v33 }
0x1392   : > { %2809 = vst.msk [vmem:[%s487_s29] sm:$0xff] %vm513_vm0, %v2808_v31 }
0x1393   : > { %3676 = shalt.err (!%p3673_p6)
}
0x1394   : > { %s3677_s1 = scalar_lea.hbm %s4372_s17, 128  ;;  %s3681_s21 = scalar_lea.hbm %s4469_s3, 512 }
0x1395   : > { %p3678_p7 = scmp.ne.s32.totalorder %s4372_s17, %s3677_s1  ;;  %p3682_p11 = scmp.lt.u32.totalorder %s4372_s17, %s4469_s3 }
0x1396   : > { %p3683_p12 = scmp.lt.u32.totalorder %s3681_s21, %s3677_s1  ;;  %p3685_p0 = scmp.lt.u32.totalorder %s3677_s1, %s4372_s17 }
0x1397   : > { %p3679_p9 = pnand %p3678_p7, %p3889_p3 }
0x1398   : > { %p3684_p13 = por %p3683_p12, %p3682_p11 }
0x1399   : > { %p3680_p10 = pneg %p3679_p9 }
0x139a   : > { %p3686_p1 = por %p3685_p0, %p3684_p13 }
0x139c   : > { %p3687_p2 = pnand %p3686_p1, %p3680_p10 }
0x139e   : > { %3690 = shalt.err (!%p3687_p2)
}
0x139f   : > { %3563 = dma.vmem_to_hbm [thread:$0]  (%p3889_p3), %s4374_s18, 128, %s4372_s17, %s2811_s16  }
0x13a0 PF: > { %s4470_s29 = sld [smem:[#allocation5_spill]]  ;;  %p3569_p4 = scmp.ge.s32.totalorder %s3757_s20, 2 }
0x13a2   : > { %p3566_p5 = pnand %p3569_p4, %p3898_p8 }
0x13a6   : > { %s2838_s26 = sand.u32 1, %s4470_s29  }
0x13a7   : > { %s2839_s27 = scalar_lea.sflag [#allocation3], %s2838_s26 }
0x13a8   : > { %3724 = dma.done.wait (!%p3566_p5), %s2839_s27, 128  }
0x13a9   : > { %3726 = vsyncadd (!%p3566_p5), %s2839_s27, 4294967168  ;;  %s27_s20 = sadd.s32 1, %s3757_s20   ;;  %s4472_s16 = sld [smem:[#allocation6_spill]] }
0x13aa   : > { %p24_p6 = scmp.ge.s32.totalorder %s27_s20, 6   ;;  %s4473_s18 = sld [smem:[#allocation7_spill]] }
0x13ab   : > { %s4474_s0 = sld [smem:[#allocation9_spill]]  ;;  %s4475_s29 = smov %s3733_s30 }
0x13ac   : > { %s4476_s30 = smov %s3737_s15  ;;  %s4477_s15 = smov %s3907_s23 }
0x13ad   : > { %s4478_s17 = smov %s3753_s19  ;;  %26 = sbr.rel (!%p24_p6) target bundleno = 11 (0xb), region = 141 }
0x13b1   : > { %s4479_s19 = smov %s4474_s0 }
0x13b4   :  { %2844 = vsyncpa [#allocation3], 1 }
0x13b5   :  { %2846 = vsyncpa [#allocation3 + $0x1], 1 }

</bundles_post_ra>
